<compile_context>
chip_gen: v5e
topology: v5e:2x2
jax: 0.10.0
libtpu: 0.0.40
codegen_flags: <defaults>
</compile_context>

<pallas_src>
import jax
import jax.numpy as jnp
from jax.experimental import pallas as pl
from jax.experimental.pallas import tpu as pltpu


def _round_up(x, m):
    return ((x + m - 1) // m) * m


# ----------------------------------------------------------------------------
# Kernel
# ----------------------------------------------------------------------------
def _make_kernel(hp, dp, fuse_skips):
    """Builds the kernel body. hp/dp are padded hidden/output dims (multiples of 128)."""
    f32 = jnp.float32

    def _body(ctx_ref, x_ref, w1_r, b1_r, w234_r, b234_r, w5_r, b5_r,
              w6_r, b6_r, skip_refs, out_ref, l6_ref):
        dopa_f = 0.5 + ctx_ref[0]       # dopamine factor
        ach_f = 0.5 + ctx_ref[1]        # acetylcholine factor

        def lin(a, w_ref, b_ref):
            # MXU matmul in the weight dtype (bf16), f32 accumulation, f32 bias add.
            return jnp.dot(a.astype(w_ref.dtype), w_ref[...],
                           preferred_element_type=f32) + b_ref[...]

        x = x_ref[...]

        # --- Layer 1 (L1): linear -> *ach -> tanh -> (dropout=id) -> extra tanh
        l1 = jnp.tanh(jnp.tanh(lin(x, w1_r, b1_r) * ach_f))

        # --- Fused Layer 2/3 + Layer 4 (shared LHS l1): one MXU pass, split on a
        #     128-lane boundary (hp is a multiple of 128).
        z = lin(l1, w234_r, b234_r)                    # (TB, 2*hp)
        z23 = z[:, :hp] * dopa_f
        l23 = jnp.where(z23 >= 0.0, z23, 0.1 * z23)    # LeakyReLU(0.1)
        z4 = z[:, hp:] * ach_f
        l4 = jnp.maximum(z4, 0.0)                      # ReLU

        # --- skip connections
        if fuse_skips:
            # Block-diagonal fusion: [l23 | l4] @ [[ws25, 0], [0, ws46]]
            wsk_r, bsk_r = skip_refs
            lhs = jnp.concatenate([l23, l4], axis=1)   # (TB, 2*hp)
            s = lin(lhs, wsk_r, bsk_r)                 # (TB, dp + hp)
            s25 = s[:, :dp]
            s46 = s[:, dp:]
        else:
            ws25_r, bs25_r, ws46_r, bs46_r = skip_refs
            s25 = lin(l23, ws25_r, bs25_r)
            s46 = lin(l4, ws46_r, bs46_r)

        # --- Layer 5 (L5): input = l4 + skip_2_5 ; linear -> *dopa -> tanh -> extra tanh
        l5 = jnp.tanh(jnp.tanh(lin(l4 + s25, w5_r, b5_r) * dopa_f))

        # --- Layer 6 (L6): input = l5 + skip_4_6 ; linear -> sigmoid (state only).
        #     sigmoid(x) == 0.5*(tanh(x/2)+1): single EUP op, exact.
        z6 = lin(l5 + s46, w6_r, b6_r)
        l6 = 0.5 * (jnp.tanh(0.5 * z6) + 1.0)

        out_ref[...] = jnp.tanh(l5)
        l6_ref[...] = l6

    if fuse_skips:
        def kernel(ctx_ref, x_ref, w1_r, b1_r, w234_r, b234_r, w5_r, b5_r,
                   w6_r, b6_r, wsk_r, bsk_r, out_ref, l6_ref):
            _body(ctx_ref, x_ref, w1_r, b1_r, w234_r, b234_r, w5_r, b5_r,
                  w6_r, b6_r, (wsk_r, bsk_r), out_ref, l6_ref)
    else:
        def kernel(ctx_ref, x_ref, w1_r, b1_r, w234_r, b234_r, w5_r, b5_r,
                   w6_r, b6_r, ws25_r, bs25_r, ws46_r, bs46_r, out_ref, l6_ref):
            _body(ctx_ref, x_ref, w1_r, b1_r, w234_r, b234_r, w5_r, b5_r,
                  w6_r, b6_r, (ws25_r, bs25_r, ws46_r, bs46_r), out_ref, l6_ref)
    return kernel


# ----------------------------------------------------------------------------
# One-time parameter preparation (hoisted out of the per-call forward path)
# ----------------------------------------------------------------------------
def prepare_params(params, weight_dtype=jnp.bfloat16):
    """Pad to lane multiples, cast weights to bf16 (biases stay f32), fuse L2/3|L4,
    and (when padded hidden == 128) block-diagonally fuse the two skip matmuls."""
    input_dim = params["w1"].shape[0]
    hidden_dim = params["w23"].shape[1]
    output_dim = params["w5"].shape[1]
    # The PyTorch model's skip additions require this; fail loudly here.
    assert hidden_dim == output_dim, (
        "CorticalModel skip connections require hidden_dim == output_dim")

    LANE = 128
    din_p = _round_up(input_dim, LANE)
    hp = _round_up(hidden_dim, LANE)
    dp = _round_up(output_dim, LANE)        # == hp
    f32 = jnp.float32

    def padw(a, rows, cols):
        a = a.astype(f32)
        a = jnp.pad(a, ((0, rows - a.shape[0]), (0, cols - a.shape[1])))
        return a.astype(weight_dtype)       # MXU-native dtype

    def padb(a, cols):
        a = a.astype(f32)
        return jnp.pad(a, ((0, 0), (0, cols - a.shape[1])))   # biases stay f32

    w1 = padw(params["w1"], din_p, hp);   b1 = padb(params["b1"], hp)
    w23 = padw(params["w23"], hp, hp);    b23 = padb(params["b23"], hp)
    w4 = padw(params["w4"], hp, hp);      b4 = padb(params["b4"], hp)
    # Fuse the two l1-fed layers into a single (hp, 2*hp) matmul.
    w234 = jnp.concatenate([w23, w4], axis=1)
    b234 = jnp.concatenate([b23, b4], axis=1)
    w5 = padw(params["w5"], hp, dp);      b5 = padb(params["b5"], dp)
    w6 = padw(params["w6"], dp, hp);      b6 = padb(params["b6"], hp)
    ws25 = padw(params["ws25"], hp, dp);  bs25 = padb(params["bs25"], dp)
    ws46 = padw(params["ws46"], hp, hp);  bs46 = padb(params["bs46"], hp)

    # When hp == 128, a single block-diagonal (256, 256) pass fills the v6e/v7x
    # MXU exactly; for hp >= 256 it would waste real FLOPs, so keep skips separate.
    fuse_skips = (hp == 128)
    if fuse_skips:
        wsk = jnp.zeros((2 * hp, dp + hp), weight_dtype)
        wsk = wsk.at[:hp, :dp].set(ws25).at[hp:, dp:].set(ws46)
        bsk = jnp.concatenate([bs25, bs46], axis=1)
        weights = (w1, b1, w234, b234, w5, b5, w6, b6, wsk, bsk)
    else:
        weights = (w1, b1, w234, b234, w5, b5, w6, b6, ws25, bs25, ws46, bs46)

    return dict(weights=weights, input_dim=input_dim, hidden_dim=hidden_dim,
                output_dim=output_dim, din_p=din_p, hp=hp, dp=dp,
                fuse_skips=fuse_skips)


# ----------------------------------------------------------------------------
# Forward
# ----------------------------------------------------------------------------
def cortical_model_forward(x, prepared, dopamine=0.5, acetylcholine=0.5):
    """x: (B, input_dim) float32. prepared: output of prepare_params()."""
    B = x.shape[0]
    input_dim = prepared["input_dim"]
    hidden_dim = prepared["hidden_dim"]
    output_dim = prepared["output_dim"]
    din_p, hp, dp = prepared["din_p"], prepared["hp"], prepared["dp"]
    weights = prepared["weights"]
    f32 = jnp.float32

    # Batch tile: up to 256 rows (fills v6e/v7x 256-wide MXU rows; two clean
    # 128-row passes on v5e).  Prefer >= 2 grid steps when the batch allows so the
    # "parallel" axis can be sharded across v7x's two TensorCores.
    tb = min(256, _round_up(B, 8))
    if B >= 256 and _round_up(B, tb) // tb < 2:
        tb = 128
    bp = _round_up(B, tb)

    xp = jnp.pad(x.astype(f32), ((0, bp - B), (0, din_p - input_dim)))
    ctx = jnp.array([dopamine, acetylcholine], dtype=f32)

    # index_maps receive the scalar-prefetch ref (ctx) as a trailing positional arg.
    batch_map = lambda i, ctx_ref: (i, 0)
    fixed_map = lambda i, ctx_ref: (0, 0)

    # Scoped-VMEM budget: single-buffered weights + double-buffered activation /
    # output tiles + headroom; clamp to 64 MiB (v7x physical ceiling).
    weight_bytes = sum(int(w.size) * w.dtype.itemsize for w in weights)
    tile_bytes = 2 * 4 * (tb * din_p + tb * dp + tb * hp)
    vmem_limit = min(max(weight_bytes + tile_bytes + (8 << 20), 32 << 20), 64 << 20)

    kernel = _make_kernel(hp, dp, prepared["fuse_skips"])

    def run(single_buffer_weights):
        if single_buffer_weights:
            # Weights use a constant index_map -> double-buffering them is pure
            # VMEM waste; single-buffer them.
            wspecs = [pl.BlockSpec(w.shape, fixed_map, pipeline_mode=pl.Buffered(1))
                      for w in weights]
        else:
            wspecs = [pl.BlockSpec(w.shape, fixed_map) for w in weights]
        return pl.pallas_call(
            kernel,
            out_shape=(
                jax.ShapeDtypeStruct((bp, dp), f32),
                jax.ShapeDtypeStruct((bp, hp), f32),
            ),
            grid_spec=pltpu.PrefetchScalarGridSpec(
                num_scalar_prefetch=1,
                grid=(bp // tb,),
                in_specs=[pl.BlockSpec((tb, din_p), batch_map)] + wspecs,
                out_specs=(pl.BlockSpec((tb, dp), batch_map),
                           pl.BlockSpec((tb, hp), batch_map)),
            ),
            compiler_params=pltpu.CompilerParams(
                dimension_semantics=("parallel",),
                vmem_limit_bytes=vmem_limit),
        )(ctx, xp, *weights)

    try:
        out_p, l6_p = run(True)
    except Exception:
        # TODO(synk): fallback for JAX builds that reject pl.Buffered(1) on a
        # pallas_call BlockSpec; costs only extra (double-buffered) weight VMEM.
        out_p, l6_p = run(False)

    # Strip padding.
    return out_p[:B, :output_dim], l6_p[:B, :hidden_dim]


# ----------------------------------------------------------------------------
# Pure-JAX reference & init
# ----------------------------------------------------------------------------
def _reference_forward(x, params, dopamine=0.5, acetylcholine=0.5):
    """Pure-JAX f32 reference of the same forward pass (for a sanity check)."""
    dopa_f = 0.5 + dopamine
    ach_f = 0.5 + acetylcholine
    lin = lambda a, w, b: a @ w + b
    l1 = jnp.tanh(jnp.tanh(lin(x, params["w1"], params["b1"]) * ach_f))
    z23 = lin(l1, params["w23"], params["b23"]) * dopa_f
    l23 = jnp.where(z23 >= 0.0, z23, 0.1 * z23)
    l4 = jnp.maximum(lin(l1, params["w4"], params["b4"]) * ach_f, 0.0)
    s25 = lin(l23, params["ws25"], params["bs25"])
    s46 = lin(l4, params["ws46"], params["bs46"])
    l5 = jnp.tanh(jnp.tanh(lin(l4 + s25, params["w5"], params["b5"]) * dopa_f))
    l6 = jax.nn.sigmoid(lin(l5 + s46, params["w6"], params["b6"]))
    return jnp.tanh(l5), l6


def init_params(key, input_dim, hidden_dim, output_dim):
    """Deterministic PyTorch-Linear-style init: U(-1/sqrt(fan_in), 1/sqrt(fan_in))."""
    shapes = {
        "w1":   (input_dim, hidden_dim),  "b1":   (1, hidden_dim),
        "w23":  (hidden_dim, hidden_dim), "b23":  (1, hidden_dim),
        "w4":   (hidden_dim, hidden_dim), "b4":   (1, hidden_dim),
        "w5":   (hidden_dim, output_dim), "b5":   (1, output_dim),
        "w6":   (output_dim, hidden_dim), "b6":   (1, hidden_dim),
        "ws25": (hidden_dim, output_dim), "bs25": (1, output_dim),
        "ws46": (hidden_dim, hidden_dim), "bs46": (1, hidden_dim),
    }
    params = {}
    keys = jax.random.split(key, len(shapes))
    for k, (name, shape) in zip(keys, shapes.items()):
        fan_in = shape[0] if name.startswith("w") else shapes["w" + name[1:]][0]
        bound = 1.0 / (fan_in ** 0.5)
        params[name] = jax.random.uniform(
            k, shape, dtype=jnp.float32, minval=-bound, maxval=bound)
    return params


if __name__ == "__main__":
    # Small shapes consistent with the module: hidden_dim == output_dim is required
    # by the PyTorch model's skip-connection additions.
    B, input_dim, hidden_dim, output_dim = 8, 16, 32, 32

    key = jax.random.PRNGKey(0)
    k_x, k_p = jax.random.split(key)
    x = jax.random.normal(k_x, (B, input_dim), dtype=jnp.float32)
    params = init_params(k_p, input_dim, hidden_dim, output_dim)

    prepared = prepare_params(params)   # one-time pad / bf16 cast / matmul fusion
    out, l6_state = cortical_model_forward(x, prepared, dopamine=0.5, acetylcholine=0.5)
    jax.block_until_ready(out)
    jax.block_until_ready(l6_state)

    assert out.shape == (B, output_dim)
    assert l6_state.shape == (B, hidden_dim)

    # Numerical sanity check against a pure-JAX f32 reference (tolerance covers the
    # bf16 MXU matmuls).
    ref_out, ref_l6 = _reference_forward(x, params, 0.5, 0.5)
    assert jnp.allclose(out, ref_out, atol=5e-2, rtol=5e-2)
    assert jnp.allclose(l6_state, ref_l6, atol=5e-2, rtol=5e-2)

    print("KERNEL_OK")
</pallas_src>

<mosaic_0001>
module attributes {stable_mosaic.version = 11 : i64} {
  func.func @kernel(%arg0: i32, %arg1: memref<2xf32, #tpu.memory_space<smem>>, %arg2: memref<8x128xf32, #tpu.memory_space<vmem>>, %arg3: memref<128x128xbf16, #tpu.memory_space<vmem>>, %arg4: memref<1x128xf32, #tpu.memory_space<vmem>>, %arg5: memref<128x256xbf16, #tpu.memory_space<vmem>>, %arg6: memref<1x256xf32, #tpu.memory_space<vmem>>, %arg7: memref<128x128xbf16, #tpu.memory_space<vmem>>, %arg8: memref<1x128xf32, #tpu.memory_space<vmem>>, %arg9: memref<128x128xbf16, #tpu.memory_space<vmem>>, %arg10: memref<1x128xf32, #tpu.memory_space<vmem>>, %arg11: memref<256x256xbf16, #tpu.memory_space<vmem>>, %arg12: memref<1x256xf32, #tpu.memory_space<vmem>>, %arg13: memref<8x128xf32, #tpu.memory_space<vmem>>, %arg14: memref<8x128xf32, #tpu.memory_space<vmem>>) attributes {dimension_semantics = [#tpu.dimension_semantics<parallel>], iteration_bounds = array<i64: 1>, scalar_prefetch = 1 : i64, scratch_operands = 0 : i64, tpu.core_type = #tpu.core_type<tc>, window_params = [{transform_indices = @transform_0, window_bounds = array<i64: 8, 128>}, {pipeline_mode = #tpu.pipeline_mode<synchronous>, transform_indices = @transform_1, window_bounds = array<i64: 128, 128>}, {pipeline_mode = #tpu.pipeline_mode<synchronous>, transform_indices = @transform_2, window_bounds = array<i64: 1, 128>}, {pipeline_mode = #tpu.pipeline_mode<synchronous>, transform_indices = @transform_3, window_bounds = array<i64: 128, 256>}, {pipeline_mode = #tpu.pipeline_mode<synchronous>, transform_indices = @transform_4, window_bounds = array<i64: 1, 256>}, {pipeline_mode = #tpu.pipeline_mode<synchronous>, transform_indices = @transform_5, window_bounds = array<i64: 128, 128>}, {pipeline_mode = #tpu.pipeline_mode<synchronous>, transform_indices = @transform_6, window_bounds = array<i64: 1, 128>}, {pipeline_mode = #tpu.pipeline_mode<synchronous>, transform_indices = @transform_7, window_bounds = array<i64: 128, 128>}, {pipeline_mode = #tpu.pipeline_mode<synchronous>, transform_indices = @transform_8, window_bounds = array<i64: 1, 128>}, {pipeline_mode = #tpu.pipeline_mode<synchronous>, transform_indices = @transform_9, window_bounds = array<i64: 256, 256>}, {pipeline_mode = #tpu.pipeline_mode<synchronous>, transform_indices = @transform_10, window_bounds = array<i64: 1, 256>}, {transform_indices = @transform_11, window_bounds = array<i64: 8, 128>}, {transform_indices = @transform_12, window_bounds = array<i64: 8, 128>}]} {
    %c0 = arith.constant 0 : index
    %0 = memref.load %arg1[%c0] : memref<2xf32, #tpu.memory_space<smem>>
    %cst = arith.constant 5.000000e-01 : f32
    %1 = arith.addf %cst, %0 : f32
    %c1 = arith.constant 1 : index
    %2 = memref.load %arg1[%c1] : memref<2xf32, #tpu.memory_space<smem>>
    %cst_0 = arith.constant 5.000000e-01 : f32
    %3 = arith.addf %cst_0, %2 : f32
    %c0_1 = arith.constant 0 : index
    %c0_2 = arith.constant 0 : index
    %4 = vector.load %arg2[%c0_1, %c0_2] : memref<8x128xf32, #tpu.memory_space<vmem>>, vector<8x128xf32>
    %5 = arith.truncf %4 : vector<8x128xf32> to vector<8x128xbf16>
    %c0_3 = arith.constant 0 : index
    %c0_4 = arith.constant 0 : index
    %6 = vector.load %arg3[%c0_3, %c0_4] : memref<128x128xbf16, #tpu.memory_space<vmem>>, vector<128x128xbf16>
    %cst_5 = arith.constant dense<0.000000e+00> : vector<8x128xf32>
    %7 = tpu.matmul %5, %6, %cst_5 {dimension_numbers = #tpu.dot_dimension_numbers<[1], [0], [0], [1], [0, 0, 1, 1], [], []>} : vector<8x128xbf16>, vector<128x128xbf16>, vector<8x128xf32> -> vector<8x128xf32>
    %c0_6 = arith.constant 0 : index
    %c0_7 = arith.constant 0 : index
    %8 = vector.load %arg4[%c0_6, %c0_7] : memref<1x128xf32, #tpu.memory_space<vmem>>, vector<1x128xf32>
    %9 = vector.broadcast %8 : vector<1x128xf32> to vector<8x128xf32>
    %10 = arith.addf %7, %9 : vector<8x128xf32>
    %11 = vector.broadcast %3 : f32 to vector<8x128xf32>
    %12 = arith.mulf %10, %11 : vector<8x128xf32>
    %13 = math.tanh %12 : vector<8x128xf32>
    %14 = math.tanh %13 : vector<8x128xf32>
    %15 = arith.truncf %14 : vector<8x128xf32> to vector<8x128xbf16>
    %c0_8 = arith.constant 0 : index
    %c0_9 = arith.constant 0 : index
    %16 = vector.load %arg5[%c0_8, %c0_9] : memref<128x256xbf16, #tpu.memory_space<vmem>>, vector<128x256xbf16>
    %cst_10 = arith.constant dense<0.000000e+00> : vector<8x256xf32>
    %17 = tpu.matmul %15, %16, %cst_10 {dimension_numbers = #tpu.dot_dimension_numbers<[1], [0], [0], [1], [0, 0, 1, 1], [], []>} : vector<8x128xbf16>, vector<128x256xbf16>, vector<8x256xf32> -> vector<8x256xf32>
    %c0_11 = arith.constant 0 : index
    %c0_12 = arith.constant 0 : index
    %18 = vector.load %arg6[%c0_11, %c0_12] : memref<1x256xf32, #tpu.memory_space<vmem>>, vector<1x256xf32>
    %19 = vector.broadcast %18 : vector<1x256xf32> to vector<8x256xf32>
    %20 = arith.addf %17, %19 : vector<8x256xf32>
    %21 = vector.extract_strided_slice %20 {offsets = [0, 0], sizes = [8, 128], strides = [1, 1]} : vector<8x256xf32> to vector<8x128xf32>
    %22 = vector.broadcast %1 : f32 to vector<8x128xf32>
    %23 = arith.mulf %21, %22 : vector<8x128xf32>
    %cst_13 = arith.constant 0.000000e+00 : f32
    %24 = vector.broadcast %cst_13 : f32 to vector<8x128xf32>
    %25 = arith.cmpf oge, %23, %24 : vector<8x128xf32>
    %cst_14 = arith.constant 1.000000e-01 : f32
    %26 = vector.broadcast %cst_14 : f32 to vector<8x128xf32>
    %27 = arith.mulf %26, %23 : vector<8x128xf32>
    %28 = arith.select %25, %23, %27 : vector<8x128xi1>, vector<8x128xf32>
    %29 = vector.extract_strided_slice %20 {offsets = [0, 128], sizes = [8, 128], strides = [1, 1]} : vector<8x256xf32> to vector<8x128xf32>
    %30 = vector.broadcast %3 : f32 to vector<8x128xf32>
    %31 = arith.mulf %29, %30 : vector<8x128xf32>
    %cst_15 = arith.constant 0.000000e+00 : f32
    %32 = vector.broadcast %cst_15 : f32 to vector<8x128xf32>
    %33 = arith.maximumf %31, %32 : vector<8x128xf32>
    %34 = tpu.concatenate %28, %33 in 1 : vector<8x128xf32>, vector<8x128xf32> -> vector<8x256xf32>
    %35 = arith.truncf %34 : vector<8x256xf32> to vector<8x256xbf16>
    %c0_16 = arith.constant 0 : index
    %c0_17 = arith.constant 0 : index
    %36 = vector.load %arg11[%c0_16, %c0_17] : memref<256x256xbf16, #tpu.memory_space<vmem>>, vector<256x256xbf16>
    %cst_18 = arith.constant dense<0.000000e+00> : vector<8x256xf32>
    %37 = tpu.matmul %35, %36, %cst_18 {dimension_numbers = #tpu.dot_dimension_numbers<[1], [0], [0], [1], [0, 0, 1, 1], [], []>} : vector<8x256xbf16>, vector<256x256xbf16>, vector<8x256xf32> -> vector<8x256xf32>
    %c0_19 = arith.constant 0 : index
    %c0_20 = arith.constant 0 : index
    %38 = vector.load %arg12[%c0_19, %c0_20] : memref<1x256xf32, #tpu.memory_space<vmem>>, vector<1x256xf32>
    %39 = vector.broadcast %38 : vector<1x256xf32> to vector<8x256xf32>
    %40 = arith.addf %37, %39 : vector<8x256xf32>
    %41 = vector.extract_strided_slice %40 {offsets = [0, 0], sizes = [8, 128], strides = [1, 1]} : vector<8x256xf32> to vector<8x128xf32>
    %42 = vector.extract_strided_slice %40 {offsets = [0, 128], sizes = [8, 128], strides = [1, 1]} : vector<8x256xf32> to vector<8x128xf32>
    %43 = arith.addf %33, %41 : vector<8x128xf32>
    %44 = arith.truncf %43 : vector<8x128xf32> to vector<8x128xbf16>
    %c0_21 = arith.constant 0 : index
    %c0_22 = arith.constant 0 : index
    %45 = vector.load %arg7[%c0_21, %c0_22] : memref<128x128xbf16, #tpu.memory_space<vmem>>, vector<128x128xbf16>
    %cst_23 = arith.constant dense<0.000000e+00> : vector<8x128xf32>
    %46 = tpu.matmul %44, %45, %cst_23 {dimension_numbers = #tpu.dot_dimension_numbers<[1], [0], [0], [1], [0, 0, 1, 1], [], []>} : vector<8x128xbf16>, vector<128x128xbf16>, vector<8x128xf32> -> vector<8x128xf32>
    %c0_24 = arith.constant 0 : index
    %c0_25 = arith.constant 0 : index
    %47 = vector.load %arg8[%c0_24, %c0_25] : memref<1x128xf32, #tpu.memory_space<vmem>>, vector<1x128xf32>
    %48 = vector.broadcast %47 : vector<1x128xf32> to vector<8x128xf32>
    %49 = arith.addf %46, %48 : vector<8x128xf32>
    %50 = vector.broadcast %1 : f32 to vector<8x128xf32>
    %51 = arith.mulf %49, %50 : vector<8x128xf32>
    %52 = math.tanh %51 : vector<8x128xf32>
    %53 = math.tanh %52 : vector<8x128xf32>
    %54 = arith.addf %53, %42 : vector<8x128xf32>
    %55 = arith.truncf %54 : vector<8x128xf32> to vector<8x128xbf16>
    %c0_26 = arith.constant 0 : index
    %c0_27 = arith.constant 0 : index
    %56 = vector.load %arg9[%c0_26, %c0_27] : memref<128x128xbf16, #tpu.memory_space<vmem>>, vector<128x128xbf16>
    %cst_28 = arith.constant dense<0.000000e+00> : vector<8x128xf32>
    %57 = tpu.matmul %55, %56, %cst_28 {dimension_numbers = #tpu.dot_dimension_numbers<[1], [0], [0], [1], [0, 0, 1, 1], [], []>} : vector<8x128xbf16>, vector<128x128xbf16>, vector<8x128xf32> -> vector<8x128xf32>
    %c0_29 = arith.constant 0 : index
    %c0_30 = arith.constant 0 : index
    %58 = vector.load %arg10[%c0_29, %c0_30] : memref<1x128xf32, #tpu.memory_space<vmem>>, vector<1x128xf32>
    %59 = vector.broadcast %58 : vector<1x128xf32> to vector<8x128xf32>
    %60 = arith.addf %57, %59 : vector<8x128xf32>
    %cst_31 = arith.constant 5.000000e-01 : f32
    %61 = vector.broadcast %cst_31 : f32 to vector<8x128xf32>
    %62 = arith.mulf %61, %60 : vector<8x128xf32>
    %63 = math.tanh %62 : vector<8x128xf32>
    %cst_32 = arith.constant 1.000000e+00 : f32
    %64 = vector.broadcast %cst_32 : f32 to vector<8x128xf32>
    %65 = arith.addf %63, %64 : vector<8x128xf32>
    %cst_33 = arith.constant 5.000000e-01 : f32
    %66 = vector.broadcast %cst_33 : f32 to vector<8x128xf32>
    %67 = arith.mulf %66, %65 : vector<8x128xf32>
    %68 = math.tanh %53 : vector<8x128xf32>
    %c0_34 = arith.constant 0 : index
    %c0_35 = arith.constant 0 : index
    %69 = vector.load %arg13[%c0_34, %c0_35] : memref<8x128xf32, #tpu.memory_space<vmem>>, vector<8x128xf32>
    tpu.vector_store %arg13[%c0_34, %c0_35], %68 {strides = array<i32>} : memref<8x128xf32, #tpu.memory_space<vmem>>, vector<8x128xf32>,
    %c0_36 = arith.constant 0 : index
    %c0_37 = arith.constant 0 : index
    %70 = vector.load %arg14[%c0_36, %c0_37] : memref<8x128xf32, #tpu.memory_space<vmem>>, vector<8x128xf32>
    tpu.vector_store %arg14[%c0_36, %c0_37], %67 {strides = array<i32>} : memref<8x128xf32, #tpu.memory_space<vmem>>, vector<8x128xf32>,
    return
  }
  func.func @transform_0(%arg0: i32, %arg1: memref<2xf32, #tpu.memory_space<smem>>) -> (i32, i32) {
    %c0_i32 = arith.constant 0 : i32
    %c0_i32_0 = arith.constant 0 : i32
    return %arg0, %c0_i32 : i32, i32
  }
  func.func @transform_1(%arg0: i32, %arg1: memref<2xf32, #tpu.memory_space<smem>>) -> (i32, i32) {
    %c0_i32 = arith.constant 0 : i32
    %c0_i32_0 = arith.constant 0 : i32
    %c0_i32_1 = arith.constant 0 : i32
    return %c0_i32, %c0_i32_0 : i32, i32
  }
  func.func @transform_2(%arg0: i32, %arg1: memref<2xf32, #tpu.memory_space<smem>>) -> (i32, i32) {
    %c0_i32 = arith.constant 0 : i32
    %c0_i32_0 = arith.constant 0 : i32
    %c0_i32_1 = arith.constant 0 : i32
    return %c0_i32, %c0_i32_0 : i32, i32
  }
  func.func @transform_3(%arg0: i32, %arg1: memref<2xf32, #tpu.memory_space<smem>>) -> (i32, i32) {
    %c0_i32 = arith.constant 0 : i32
    %c0_i32_0 = arith.constant 0 : i32
    %c0_i32_1 = arith.constant 0 : i32
    return %c0_i32, %c0_i32_0 : i32, i32
  }
  func.func @transform_4(%arg0: i32, %arg1: memref<2xf32, #tpu.memory_space<smem>>) -> (i32, i32) {
    %c0_i32 = arith.constant 0 : i32
    %c0_i32_0 = arith.constant 0 : i32
    %c0_i32_1 = arith.constant 0 : i32
    return %c0_i32, %c0_i32_0 : i32, i32
  }
  func.func @transform_5(%arg0: i32, %arg1: memref<2xf32, #tpu.memory_space<smem>>) -> (i32, i32) {
    %c0_i32 = arith.constant 0 : i32
    %c0_i32_0 = arith.constant 0 : i32
    %c0_i32_1 = arith.constant 0 : i32
    return %c0_i32, %c0_i32_0 : i32, i32
  }
  func.func @transform_6(%arg0: i32, %arg1: memref<2xf32, #tpu.memory_space<smem>>) -> (i32, i32) {
    %c0_i32 = arith.constant 0 : i32
    %c0_i32_0 = arith.constant 0 : i32
    %c0_i32_1 = arith.constant 0 : i32
    return %c0_i32, %c0_i32_0 : i32, i32
  }
  func.func @transform_7(%arg0: i32, %arg1: memref<2xf32, #tpu.memory_space<smem>>) -> (i32, i32) {
    %c0_i32 = arith.constant 0 : i32
    %c0_i32_0 = arith.constant 0 : i32
    %c0_i32_1 = arith.constant 0 : i32
    return %c0_i32, %c0_i32_0 : i32, i32
  }
  func.func @transform_8(%arg0: i32, %arg1: memref<2xf32, #tpu.memory_space<smem>>) -> (i32, i32) {
    %c0_i32 = arith.constant 0 : i32
    %c0_i32_0 = arith.constant 0 : i32
    %c0_i32_1 = arith.constant 0 : i32
    return %c0_i32, %c0_i32_0 : i32, i32
  }
  func.func @transform_9(%arg0: i32, %arg1: memref<2xf32, #tpu.memory_space<smem>>) -> (i32, i32) {
    %c0_i32 = arith.constant 0 : i32
    %c0_i32_0 = arith.constant 0 : i32
    %c0_i32_1 = arith.constant 0 : i32
    return %c0_i32, %c0_i32_0 : i32, i32
  }
  func.func @transform_10(%arg0: i32, %arg1: memref<2xf32, #tpu.memory_space<smem>>) -> (i32, i32) {
    %c0_i32 = arith.constant 0 : i32
    %c0_i32_0 = arith.constant 0 : i32
    %c0_i32_1 = arith.constant 0 : i32
    return %c0_i32, %c0_i32_0 : i32, i32
  }
  func.func @transform_11(%arg0: i32, %arg1: memref<2xf32, #tpu.memory_space<smem>>) -> (i32, i32) {
    %c0_i32 = arith.constant 0 : i32
    %c0_i32_0 = arith.constant 0 : i32
    return %arg0, %c0_i32 : i32, i32
  }
  func.func @transform_12(%arg0: i32, %arg1: memref<2xf32, #tpu.memory_space<smem>>) -> (i32, i32) {
    %c0_i32 = arith.constant 0 : i32
    %c0_i32_0 = arith.constant 0 : i32
    return %arg0, %c0_i32 : i32, i32
  }
}

module attributes {stable_mosaic.version = 11 : i64} {
  func.func @kernel(%arg0: i32, %arg1: memref<2xf32, #tpu.memory_space<smem>>, %arg2: memref<8x128xf32, #tpu.memory_space<vmem>>, %arg3: memref<128x128xbf16, #tpu.memory_space<vmem>>, %arg4: memref<1x128xf32, #tpu.memory_space<vmem>>, %arg5: memref<128x256xbf16, #tpu.memory_space<vmem>>, %arg6: memref<1x256xf32, #tpu.memory_space<vmem>>, %arg7: memref<128x128xbf16, #tpu.memory_space<vmem>>, %arg8: memref<1x128xf32, #tpu.memory_space<vmem>>, %arg9: memref<128x128xbf16, #tpu.memory_space<vmem>>, %arg10: memref<1x128xf32, #tpu.memory_space<vmem>>, %arg11: memref<256x256xbf16, #tpu.memory_space<vmem>>, %arg12: memref<1x256xf32, #tpu.memory_space<vmem>>, %arg13: memref<8x128xf32, #tpu.memory_space<vmem>>, %arg14: memref<8x128xf32, #tpu.memory_space<vmem>>) attributes {dimension_semantics = [#tpu.dimension_semantics<parallel>], iteration_bounds = array<i64: 1>, scalar_prefetch = 1 : i64, scratch_operands = 0 : i64, tpu.core_type = #tpu.core_type<tc>, window_params = [{transform_indices = @transform_0, window_bounds = array<i64: 8, 128>}, {pipeline_mode = #tpu.pipeline_mode<synchronous>, transform_indices = @transform_1, window_bounds = array<i64: 128, 128>}, {pipeline_mode = #tpu.pipeline_mode<synchronous>, transform_indices = @transform_2, window_bounds = array<i64: 1, 128>}, {pipeline_mode = #tpu.pipeline_mode<synchronous>, transform_indices = @transform_3, window_bounds = array<i64: 128, 256>}, {pipeline_mode = #tpu.pipeline_mode<synchronous>, transform_indices = @transform_4, window_bounds = array<i64: 1, 256>}, {pipeline_mode = #tpu.pipeline_mode<synchronous>, transform_indices = @transform_5, window_bounds = array<i64: 128, 128>}, {pipeline_mode = #tpu.pipeline_mode<synchronous>, transform_indices = @transform_6, window_bounds = array<i64: 1, 128>}, {pipeline_mode = #tpu.pipeline_mode<synchronous>, transform_indices = @transform_7, window_bounds = array<i64: 128, 128>}, {pipeline_mode = #tpu.pipeline_mode<synchronous>, transform_indices = @transform_8, window_bounds = array<i64: 1, 128>}, {pipeline_mode = #tpu.pipeline_mode<synchronous>, transform_indices = @transform_9, window_bounds = array<i64: 256, 256>}, {pipeline_mode = #tpu.pipeline_mode<synchronous>, transform_indices = @transform_10, window_bounds = array<i64: 1, 256>}, {transform_indices = @transform_11, window_bounds = array<i64: 8, 128>}, {transform_indices = @transform_12, window_bounds = array<i64: 8, 128>}]} {
    %c0 = arith.constant 0 : index
    %0 = memref.load %arg1[%c0] : memref<2xf32, #tpu.memory_space<smem>>
    %cst = arith.constant 5.000000e-01 : f32
    %1 = arith.addf %cst, %0 : f32
    %c1 = arith.constant 1 : index
    %2 = memref.load %arg1[%c1] : memref<2xf32, #tpu.memory_space<smem>>
    %cst_0 = arith.constant 5.000000e-01 : f32
    %3 = arith.addf %cst_0, %2 : f32
    %c0_1 = arith.constant 0 : index
    %c0_2 = arith.constant 0 : index
    %4 = vector.load %arg2[%c0_1, %c0_2] : memref<8x128xf32, #tpu.memory_space<vmem>>, vector<8x128xf32>
    %5 = arith.truncf %4 : vector<8x128xf32> to vector<8x128xbf16>
    %c0_3 = arith.constant 0 : index
    %c0_4 = arith.constant 0 : index
    %6 = vector.load %arg3[%c0_3, %c0_4] : memref<128x128xbf16, #tpu.memory_space<vmem>>, vector<128x128xbf16>
    %cst_5 = arith.constant dense<0.000000e+00> : vector<8x128xf32>
    %7 = tpu.matmul %5, %6, %cst_5 {dimension_numbers = #tpu.dot_dimension_numbers<[1], [0], [0], [1], [0, 0, 1, 1], [], []>} : vector<8x128xbf16>, vector<128x128xbf16>, vector<8x128xf32> -> vector<8x128xf32>
    %c0_6 = arith.constant 0 : index
    %c0_7 = arith.constant 0 : index
    %8 = vector.load %arg4[%c0_6, %c0_7] : memref<1x128xf32, #tpu.memory_space<vmem>>, vector<1x128xf32>
    %9 = vector.broadcast %8 : vector<1x128xf32> to vector<8x128xf32>
    %10 = arith.addf %7, %9 : vector<8x128xf32>
    %11 = vector.broadcast %3 : f32 to vector<8x128xf32>
    %12 = arith.mulf %10, %11 : vector<8x128xf32>
    %13 = math.tanh %12 : vector<8x128xf32>
    %14 = math.tanh %13 : vector<8x128xf32>
    %15 = arith.truncf %14 : vector<8x128xf32> to vector<8x128xbf16>
    %c0_8 = arith.constant 0 : index
    %c0_9 = arith.constant 0 : index
    %16 = vector.load %arg5[%c0_8, %c0_9] : memref<128x256xbf16, #tpu.memory_space<vmem>>, vector<128x256xbf16>
    %cst_10 = arith.constant dense<0.000000e+00> : vector<8x256xf32>
    %17 = tpu.matmul %15, %16, %cst_10 {dimension_numbers = #tpu.dot_dimension_numbers<[1], [0], [0], [1], [0, 0, 1, 1], [], []>} : vector<8x128xbf16>, vector<128x256xbf16>, vector<8x256xf32> -> vector<8x256xf32>
    %c0_11 = arith.constant 0 : index
    %c0_12 = arith.constant 0 : index
    %18 = vector.load %arg6[%c0_11, %c0_12] : memref<1x256xf32, #tpu.memory_space<vmem>>, vector<1x256xf32>
    %19 = vector.broadcast %18 : vector<1x256xf32> to vector<8x256xf32>
    %20 = arith.addf %17, %19 : vector<8x256xf32>
    %21 = vector.extract_strided_slice %20 {offsets = [0, 0], sizes = [8, 128], strides = [1, 1]} : vector<8x256xf32> to vector<8x128xf32>
    %22 = vector.broadcast %1 : f32 to vector<8x128xf32>
    %23 = arith.mulf %21, %22 : vector<8x128xf32>
    %cst_13 = arith.constant 0.000000e+00 : f32
    %24 = vector.broadcast %cst_13 : f32 to vector<8x128xf32>
    %25 = arith.cmpf oge, %23, %24 : vector<8x128xf32>
    %cst_14 = arith.constant 1.000000e-01 : f32
    %26 = vector.broadcast %cst_14 : f32 to vector<8x128xf32>
    %27 = arith.mulf %26, %23 : vector<8x128xf32>
    %28 = arith.select %25, %23, %27 : vector<8x128xi1>, vector<8x128xf32>
    %29 = vector.extract_strided_slice %20 {offsets = [0, 128], sizes = [8, 128], strides = [1, 1]} : vector<8x256xf32> to vector<8x128xf32>
    %30 = vector.broadcast %3 : f32 to vector<8x128xf32>
    %31 = arith.mulf %29, %30 : vector<8x128xf32>
    %cst_15 = arith.constant 0.000000e+00 : f32
    %32 = vector.broadcast %cst_15 : f32 to vector<8x128xf32>
    %33 = arith.maximumf %31, %32 : vector<8x128xf32>
    %34 = tpu.concatenate %28, %33 in 1 : vector<8x128xf32>, vector<8x128xf32> -> vector<8x256xf32>
    %35 = arith.truncf %34 : vector<8x256xf32> to vector<8x256xbf16>
    %c0_16 = arith.constant 0 : index
    %c0_17 = arith.constant 0 : index
    %36 = vector.load %arg11[%c0_16, %c0_17] : memref<256x256xbf16, #tpu.memory_space<vmem>>, vector<256x256xbf16>
    %cst_18 = arith.constant dense<0.000000e+00> : vector<8x256xf32>
    %37 = tpu.matmul %35, %36, %cst_18 {dimension_numbers = #tpu.dot_dimension_numbers<[1], [0], [0], [1], [0, 0, 1, 1], [], []>} : vector<8x256xbf16>, vector<256x256xbf16>, vector<8x256xf32> -> vector<8x256xf32>
    %c0_19 = arith.constant 0 : index
    %c0_20 = arith.constant 0 : index
    %38 = vector.load %arg12[%c0_19, %c0_20] : memref<1x256xf32, #tpu.memory_space<vmem>>, vector<1x256xf32>
    %39 = vector.broadcast %38 : vector<1x256xf32> to vector<8x256xf32>
    %40 = arith.addf %37, %39 : vector<8x256xf32>
    %41 = vector.extract_strided_slice %40 {offsets = [0, 0], sizes = [8, 128], strides = [1, 1]} : vector<8x256xf32> to vector<8x128xf32>
    %42 = vector.extract_strided_slice %40 {offsets = [0, 128], sizes = [8, 128], strides = [1, 1]} : vector<8x256xf32> to vector<8x128xf32>
    %43 = arith.addf %33, %41 : vector<8x128xf32>
    %44 = arith.truncf %43 : vector<8x128xf32> to vector<8x128xbf16>
    %c0_21 = arith.constant 0 : index
    %c0_22 = arith.constant 0 : index
    %45 = vector.load %arg7[%c0_21, %c0_22] : memref<128x128xbf16, #tpu.memory_space<vmem>>, vector<128x128xbf16>
    %cst_23 = arith.constant dense<0.000000e+00> : vector<8x128xf32>
    %46 = tpu.matmul %44, %45, %cst_23 {dimension_numbers = #tpu.dot_dimension_numbers<[1], [0], [0], [1], [0, 0, 1, 1], [], []>} : vector<8x128xbf16>, vector<128x128xbf16>, vector<8x128xf32> -> vector<8x128xf32>
    %c0_24 = arith.constant 0 : index
    %c0_25 = arith.constant 0 : index
    %47 = vector.load %arg8[%c0_24, %c0_25] : memref<1x128xf32, #tpu.memory_space<vmem>>, vector<1x128xf32>
    %48 = vector.broadcast %47 : vector<1x128xf32> to vector<8x128xf32>
    %49 = arith.addf %46, %48 : vector<8x128xf32>
    %50 = vector.broadcast %1 : f32 to vector<8x128xf32>
    %51 = arith.mulf %49, %50 : vector<8x128xf32>
    %52 = math.tanh %51 : vector<8x128xf32>
    %53 = math.tanh %52 : vector<8x128xf32>
    %54 = arith.addf %53, %42 : vector<8x128xf32>
    %55 = arith.truncf %54 : vector<8x128xf32> to vector<8x128xbf16>
    %c0_26 = arith.constant 0 : index
    %c0_27 = arith.constant 0 : index
    %56 = vector.load %arg9[%c0_26, %c0_27] : memref<128x128xbf16, #tpu.memory_space<vmem>>, vector<128x128xbf16>
    %cst_28 = arith.constant dense<0.000000e+00> : vector<8x128xf32>
    %57 = tpu.matmul %55, %56, %cst_28 {dimension_numbers = #tpu.dot_dimension_numbers<[1], [0], [0], [1], [0, 0, 1, 1], [], []>} : vector<8x128xbf16>, vector<128x128xbf16>, vector<8x128xf32> -> vector<8x128xf32>
    %c0_29 = arith.constant 0 : index
    %c0_30 = arith.constant 0 : index
    %58 = vector.load %arg10[%c0_29, %c0_30] : memref<1x128xf32, #tpu.memory_space<vmem>>, vector<1x128xf32>
    %59 = vector.broadcast %58 : vector<1x128xf32> to vector<8x128xf32>
    %60 = arith.addf %57, %59 : vector<8x128xf32>
    %cst_31 = arith.constant 5.000000e-01 : f32
    %61 = vector.broadcast %cst_31 : f32 to vector<8x128xf32>
    %62 = arith.mulf %61, %60 : vector<8x128xf32>
    %63 = math.tanh %62 : vector<8x128xf32>
    %cst_32 = arith.constant 1.000000e+00 : f32
    %64 = vector.broadcast %cst_32 : f32 to vector<8x128xf32>
    %65 = arith.addf %63, %64 : vector<8x128xf32>
    %cst_33 = arith.constant 5.000000e-01 : f32
    %66 = vector.broadcast %cst_33 : f32 to vector<8x128xf32>
    %67 = arith.mulf %66, %65 : vector<8x128xf32>
    %68 = math.tanh %53 : vector<8x128xf32>
    %c0_34 = arith.constant 0 : index
    %c0_35 = arith.constant 0 : index
    %69 = vector.load %arg13[%c0_34, %c0_35] : memref<8x128xf32, #tpu.memory_space<vmem>>, vector<8x128xf32>
    tpu.vector_store %arg13[%c0_34, %c0_35], %68 {strides = array<i32>} : memref<8x128xf32, #tpu.memory_space<vmem>>, vector<8x128xf32>,
    %c0_36 = arith.constant 0 : index
    %c0_37 = arith.constant 0 : index
    %70 = vector.load %arg14[%c0_36, %c0_37] : memref<8x128xf32, #tpu.memory_space<vmem>>, vector<8x128xf32>
    tpu.vector_store %arg14[%c0_36, %c0_37], %67 {strides = array<i32>} : memref<8x128xf32, #tpu.memory_space<vmem>>, vector<8x128xf32>,
    return
  }
  func.func @transform_0(%arg0: i32, %arg1: memref<2xf32, #tpu.memory_space<smem>>) -> (i32, i32) {
    %c0_i32 = arith.constant 0 : i32
    %c0_i32_0 = arith.constant 0 : i32
    return %arg0, %c0_i32 : i32, i32
  }
  func.func @transform_1(%arg0: i32, %arg1: memref<2xf32, #tpu.memory_space<smem>>) -> (i32, i32) {
    %c0_i32 = arith.constant 0 : i32
    %c0_i32_0 = arith.constant 0 : i32
    %c0_i32_1 = arith.constant 0 : i32
    return %c0_i32, %c0_i32_0 : i32, i32
  }
  func.func @transform_2(%arg0: i32, %arg1: memref<2xf32, #tpu.memory_space<smem>>) -> (i32, i32) {
    %c0_i32 = arith.constant 0 : i32
    %c0_i32_0 = arith.constant 0 : i32
    %c0_i32_1 = arith.constant 0 : i32
    return %c0_i32, %c0_i32_0 : i32, i32
  }
  func.func @transform_3(%arg0: i32, %arg1: memref<2xf32, #tpu.memory_space<smem>>) -> (i32, i32) {
    %c0_i32 = arith.constant 0 : i32
    %c0_i32_0 = arith.constant 0 : i32
    %c0_i32_1 = arith.constant 0 : i32
    return %c0_i32, %c0_i32_0 : i32, i32
  }
  func.func @transform_4(%arg0: i32, %arg1: memref<2xf32, #tpu.memory_space<smem>>) -> (i32, i32) {
    %c0_i32 = arith.constant 0 : i32
    %c0_i32_0 = arith.constant 0 : i32
    %c0_i32_1 = arith.constant 0 : i32
    return %c0_i32, %c0_i32_0 : i32, i32
  }
  func.func @transform_5(%arg0: i32, %arg1: memref<2xf32, #tpu.memory_space<smem>>) -> (i32, i32) {
    %c0_i32 = arith.constant 0 : i32
    %c0_i32_0 = arith.constant 0 : i32
    %c0_i32_1 = arith.constant 0 : i32
    return %c0_i32, %c0_i32_0 : i32, i32
  }
  func.func @transform_6(%arg0: i32, %arg1: memref<2xf32, #tpu.memory_space<smem>>) -> (i32, i32) {
    %c0_i32 = arith.constant 0 : i32
    %c0_i32_0 = arith.constant 0 : i32
    %c0_i32_1 = arith.constant 0 : i32
    return %c0_i32, %c0_i32_0 : i32, i32
  }
  func.func @transform_7(%arg0: i32, %arg1: memref<2xf32, #tpu.memory_space<smem>>) -> (i32, i32) {
    %c0_i32 = arith.constant 0 : i32
    %c0_i32_0 = arith.constant 0 : i32
    %c0_i32_1 = arith.constant 0 : i32
    return %c0_i32, %c0_i32_0 : i32, i32
  }
  func.func @transform_8(%arg0: i32, %arg1: memref<2xf32, #tpu.memory_space<smem>>) -> (i32, i32) {
    %c0_i32 = arith.constant 0 : i32
    %c0_i32_0 = arith.constant 0 : i32
    %c0_i32_1 = arith.constant 0 : i32
    return %c0_i32, %c0_i32_0 : i32, i32
  }
  func.func @transform_9(%arg0: i32, %arg1: memref<2xf32, #tpu.memory_space<smem>>) -> (i32, i32) {
    %c0_i32 = arith.constant 0 : i32
    %c0_i32_0 = arith.constant 0 : i32
    %c0_i32_1 = arith.constant 0 : i32
    return %c0_i32, %c0_i32_0 : i32, i32
  }
  func.func @transform_10(%arg0: i32, %arg1: memref<2xf32, #tpu.memory_space<smem>>) -> (i32, i32) {
    %c0_i32 = arith.constant 0 : i32
    %c0_i32_0 = arith.constant 0 : i32
    %c0_i32_1 = arith.constant 0 : i32
    return %c0_i32, %c0_i32_0 : i32, i32
  }
  func.func @transform_11(%arg0: i32, %arg1: memref<2xf32, #tpu.memory_space<smem>>) -> (i32, i32) {
    %c0_i32 = arith.constant 0 : i32
    %c0_i32_0 = arith.constant 0 : i32
    return %arg0, %c0_i32 : i32, i32
  }
  func.func @transform_12(%arg0: i32, %arg1: memref<2xf32, #tpu.memory_space<smem>>) -> (i32, i32) {
    %c0_i32 = arith.constant 0 : i32
    %c0_i32_0 = arith.constant 0 : i32
    return %arg0, %c0_i32 : i32, i32
  }
}

</mosaic_0001>

<bundles_post_ra>
// kernel: tpu_custom_call.1
= control target key start
LH: loop header
LB: loop body
LE: loop exit
PB: predicated region body
PF: predicated region fallthrough
CT: control target
= control target key end

     0   :  { %s1479_s28 = smov [#allocation3]   ;;  %s1631_s0 = inlined_call_operand.hbm [shape: f32[2], index: 0, kind: input, shape index: {}]   ;;  %s1632_s1 = inlined_call_operand.hbm [shape: f32[8,128], index: 1, kind: input, shape index: {}]   ;;  %s1633_s2 = inlined_call_operand.hbm [shape: bf16[128,128], index: 2, kind: input, shape index: {}]   ;;  %s1634_s3 = inlined_call_operand.hbm [shape: f32[1,128], index: 3, kind: input, shape index: {}]   ;;  %s1635_s4 = inlined_call_operand.hbm [shape: bf16[128,256], index: 4, kind: input, shape index: {}]   ;;  %s1636_s5 = inlined_call_operand.vmem [shape: f32[1,256], index: 5, kind: input, shape index: {}]   ;;  %s1637_s6 = inlined_call_operand.hbm [shape: bf16[128,128], index: 6, kind: input, shape index: {}]   ;;  %s1638_s7 = inlined_call_operand.vmem [shape: f32[1,128], index: 7, kind: input, shape index: {}]   ;;  %s1639_s8 = inlined_call_operand.hbm [shape: bf16[128,128], index: 8, kind: input, shape index: {}]   ;;  %s1640_s9 = inlined_call_operand.vmem [shape: f32[1,128], index: 9, kind: input, shape index: {}]   ;;  %s1641_s10 = inlined_call_operand.hbm [shape: bf16[256,256], index: 10, kind: input, shape index: {}]   ;;  %s1642_s11 = inlined_call_operand.vmem [shape: f32[1,256], index: 11, kind: input, shape index: {}]   ;;  %s1643_s12 = inlined_call_operand.hbm [shape: f32[8,128], index: 12, kind: output, shape index: {0}]   ;;  %s1644_s13 = inlined_call_operand.hbm [shape: f32[8,128], index: 13, kind: output, shape index: {1}]  }
   0x1   :  { %s20_s27 = sshll.u32 %s1631_s0, 4  ;;  %s21_s27 = int_to_ptr.hbm [resolvable:$true] %s20_s27 }
   0x2   :  { %23 = dma.hbm_to_smem %s21_s27, 16, %s1479_s28, [#allocation2] }
   0x3   :  { %1465 = dma.done.wait [#allocation2], 16 }
   0x4   :  { %1466 = vsyncadd [#allocation2], 4294967280 }
   0x5   :  { %26 = sfence }
   0x6   :  { %27 = vsyncpa [#allocation5], 0 }
   0x7   :  { %28 = vsyncpa [#allocation8], 0 }
   0x8   :  { %29 = vsyncpa [#allocation11], 0 }
   0x9   :  { %30 = vsyncpa [#allocation14], 0 }
   0xa   :  { %31 = vsyncpa [#allocation6], 0  ;;  %s48_s14 = sshll.u32 %s1633_s2, 4  ;;  %s49_s14 = int_to_ptr.hbm [resolvable:$true] %s48_s14 }
   0xb   :  { %32 = vsyncpa [#allocation18], 0  ;;  %s1480_s15 = smov [#allocation7]   ;;  %s72_s18 = sshll.u32 %s1635_s4, 4  ;;  %s73_s18 = int_to_ptr.hbm [resolvable:$true] %s72_s18 }
   0xc   :  { %s50_s16 = sshll.u32 %s1480_s15, 4  ;;  %s1481_s19 = smov 64   ;;  %s51_s16 = int_to_ptr.vmem [resolvable:$true] %s50_s16 }
   0xd   :  { %s1482_s20 = smov 4   ;;  %s1483_s21 = smov [#allocation10]  }
   0xe   :  { %56 = dma.hbm_to_vmem [thread:$0]  %s49_s14, 1024, %s51_s16, [#allocation8], %s1481_s19, %s1481_s19, %s1482_s20  }
   0xf   :  { %s74_s22 = sshll.u32 %s1483_s21, 4  ;;  %s1484_s2 = smov 128   ;;  %s75_s22 = int_to_ptr.vmem [resolvable:$true] %s74_s22 }
  0x10   :  { %s1485_s23 = smov 8   ;;  %s102_s4 = sshll.u32 %s1639_s8, 4  ;;  %s103_s4 = int_to_ptr.hbm [resolvable:$true] %s102_s4 }
  0x11   :  { %80 = dma.hbm_to_vmem [thread:$0]  %s73_s18, 2048, %s75_s22, [#allocation11], %s1484_s2, %s1484_s2, %s1485_s23  }
  0x12   :  { %s1486_s26 = smov [#allocation13]   ;;  %s38_s30 = sshll.u32 %s1632_s1, 4  ;;  %s39_s30 = int_to_ptr.hbm [resolvable:$true] %s38_s30 }
  0x13   :  { %s104_s27 = sshll.u32 %s1486_s26, 4  ;;  %s1487_s14 = smov [#allocation4]   ;;  %s105_s27 = int_to_ptr.vmem [resolvable:$true] %s104_s27 }
  0x14   :  { %110 = dma.hbm_to_vmem [thread:$0]  %s103_s4, 1024, %s105_s27, [#allocation14], %s1481_s19, %s1481_s19, %s1482_s20  }
  0x15   :  { %s40_s15 = sshll.u32 %s1487_s14, 4  ;;  %s62_s17 = sshll.u32 %s1634_s3, 4  ;;  %s41_s15 = int_to_ptr.vmem [resolvable:$true] %s40_s15  ;;  %s63_s17 = int_to_ptr.hbm [resolvable:$true] %s62_s17 }
  0x16   :  { %43 = dma.hbm_to_vmem [thread:$0]  %s39_s30, 128, %s41_s15, [#allocation5]  }
  0x17   :  { %s87_s21 = sshll.u32 %s1637_s6, 4  ;;  %s1488_s22 = smov [#allocation9]   ;;  %s88_s21 = int_to_ptr.hbm [resolvable:$true] %s87_s21 }
  0x18   :  { %s64_s1 = sshll.u32 %s1488_s22, 4  ;;  %s1489_s24 = smov [#allocation12]   ;;  %s65_s1 = int_to_ptr.vmem [resolvable:$true] %s64_s1 }
  0x19   :  { %67 = dma.hbm_to_vmem [thread:$0]  %s63_s17, 16, %s65_s1, [#allocation8]  }
  0x1a   :  { %s89_s25 = sshll.u32 %s1489_s24, 4  ;;  %s117_s27 = sshll.u32 %s1641_s10, 4  ;;  %s90_s25 = int_to_ptr.vmem [resolvable:$true] %s89_s25  ;;  %s118_s27 = int_to_ptr.hbm [resolvable:$true] %s117_s27 }
  0x1b   :  { %95 = dma.hbm_to_vmem [thread:$0]  %s88_s21, 1024, %s90_s25, [#allocation11], %s1481_s19, %s1481_s19, %s1482_s20  }
  0x1c   :  { %s1490_s3 = smov [#allocation15]  }
  0x1d   :  { %s119_s28 = sshll.u32 %s1490_s3, 4  ;;  %s120_s28 = int_to_ptr.vmem [resolvable:$true] %s119_s28 }
  0x1e   :  { %125 = dma.hbm_to_vmem [thread:$0]  %s118_s27, 4096, %s120_s28, [#allocation14], %s1484_s2, %s1484_s2, %s1485_s23  }
  0x1f   :  { %1467 = dma.done.wait [#allocation5], 128  }
  0x20   :  { %1468 = vsyncadd [#allocation5], 4294967168 }
  0x21   :  { %1469 = dma.done.wait [#allocation8], 1040  }
  0x22   :  { %1470 = vsyncadd [#allocation8], 4294966256 }
  0x23   :  { %1471 = dma.done.wait [#allocation11], 3072  }
  0x24   :  { %1472 = vsyncadd [#allocation11], 4294964224 }
  0x25   :  { %1473 = dma.done.wait [#allocation14], 5120  }
  0x26   :  { %1474 = vsyncadd [#allocation14], 4294962176  ;;  %v1143_v0 = vld [vmem:[#allocation7 + $0x38] sm:$0xff]  ;;  %v1142_v1 = vld [vmem:[#allocation7 + $0x30] sm:$0xff]  ;;  %s1602_s6 = sld [smem:[#allocation3 + $0x1]]  ;;  %s1491_s14 = smov [#allocation16]  }
  0x27   :  { %230 = vmatpush.bf16.msra.mxu0 %v1143_v0  ;;  %v938_v2 = vld [vmem:[#allocation10 + $0x70] sm:$0xf]  ;;  %v1159_v3 = vld [vmem:[#allocation10 + $0x74] sm:$0xf0]  ;;  %v1158_v4 = vld [vmem:[#allocation10 + $0x74] sm:$0xf] }
  0x28   :  { %v939_v5 = vor.u32 %v1159_v3, %v938_v2  ;;  %v940_v6 = vld [vmem:[#allocation10 + $0x78] sm:$0xf0]  ;;  %v930_v7 = vld [vmem:[#allocation10 + $0x60] sm:$0xf]  ;;  %v1157_v8 = vld [vmem:[#allocation10 + $0x64] sm:$0xf0] }
  0x29   :  { %v943_v9 = vor.u32 %v1158_v4, %v940_v6  ;;  %v1156_v10 = vld [vmem:[#allocation10 + $0x64] sm:$0xf]  ;;  %v932_v11 = vld [vmem:[#allocation10 + $0x68] sm:$0xf0]  ;;  %v931_v13 = vor.u32 %v1157_v8, %v930_v7  ;;  %v922_v14 = vld [vmem:[#allocation10 + $0x50] sm:$0xf] }
  0x2a   :  { %v1141_v12 = vld [vmem:[#allocation7 + $0x28] sm:$0xff]  ;;  %350 = vmatpush.bf16.msra.mxu1 %v939_v5  ;;  %v935_v15 = vor.u32 %v1156_v10, %v932_v11  ;;  %v1155_v16 = vld [vmem:[#allocation10 + $0x54] sm:$0xf0]  ;;  %v1154_v17 = vld [vmem:[#allocation10 + $0x54] sm:$0xf]  ;;  %s156_s19 = sld [smem:[#allocation3]] }
  0x2b   :  { %231 = vmatpush.bf16.msra.mxu0 %v1142_v1  ;;  %363 = vmatpush.bf16.msra.mxu2 %v943_v9  ;;  %v924_v18 = vld [vmem:[#allocation10 + $0x58] sm:$0xf0]  ;;  %v923_v20 = vor.u32 %v1155_v16, %v922_v14  ;;  %v1138_v23 = vld [vmem:[#allocation7 + $0x10] sm:$0xff]  ;;  %v1137_v24 = vld [vmem:[#allocation7 + $0x8] sm:$0xff]  ;;  %s816_s15 = sshll.u32 %s1491_s14, 4  ;;  %s1492_s18 = smov [#allocation17]   ;;  %s817_s15 = int_to_ptr.vmem [resolvable:$true] %s816_s15 }
  0x2c   :  { %v1140_v19 = vld [vmem:[#allocation7 + $0x20] sm:$0xff]  ;;  %v927_v21 = vor.u32 %v1154_v17, %v924_v18  ;;  %v1139_v22 = vld [vmem:[#allocation7 + $0x18] sm:$0xff]  ;;  %v1153_v29 = vld [vmem:[#allocation10 + $0x44] sm:$0xf0]  ;;  %s159_s10 = sadd.f32 0.5, %s1602_s6  ;;  %s827_s21 = sshll.u32 %s1492_s18, 4  ;;  %s828_s21 = int_to_ptr.vmem [resolvable:$true] %s827_s21 }
  0x2d   :  { %v1136_v25 = vld [vmem:[#allocation7] sm:$0xff]  ;;  %v160_v26 = vld [vmem:[#allocation4] sm:$0xff]  ;;  %v916_v32 = vld [vmem:[#allocation10 + $0x48] sm:$0xf0]  ;;  %s829_s24 = sshll.u32 %s1644_s13, 4  ;;  %s830_s24 = int_to_ptr.hbm [resolvable:$true] %s829_s24 }
  0x2e   :  { %351 = vmatpush.bf16.msra.mxu1 %v931_v13  ;;  %v161_v27 = vpack.c.bf16 %v160_v26, %v160_v26  ;;  %v914_v28 = vld [vmem:[#allocation10 + $0x40] sm:$0xf]  ;;  %v1152_v30 = vld [vmem:[#allocation10 + $0x44] sm:$0xf]  ;;  %v906_v34 = vld [vmem:[#allocation10 + $0x30] sm:$0xf] }
  0x2f   :  { %232 = vmatpush.bf16.msra.mxu0 %v1141_v12  ;;  %364 = vmatpush.bf16.msra.mxu2 %v935_v15  ;;  %v915_v31 = vor.u32 %v1153_v29, %v914_v28  ;;  %v919_v33 = vor.u32 %v1152_v30, %v916_v32  ;;  %v1151_v35 = vld [vmem:[#allocation10 + $0x34] sm:$0xf0]  ;;  %v1150_v36 = vld [vmem:[#allocation10 + $0x34] sm:$0xf]  ;;  %v908_v38 = vld [vmem:[#allocation10 + $0x38] sm:$0xf0] }
  0x30   :  { %v907_v37 = vor.u32 %v1151_v35, %v906_v34  ;;  %v911_v39 = vor.u32 %v1150_v36, %v908_v38  ;;  %v898_v40 = vld [vmem:[#allocation10 + $0x20] sm:$0xf]  ;;  %v1149_v41 = vld [vmem:[#allocation10 + $0x24] sm:$0xf0]  ;;  %v1148_v42 = vld [vmem:[#allocation10 + $0x24] sm:$0xf] }
  0x31   :  { %v899_v43 = vor.u32 %v1149_v41, %v898_v40  ;;  %v900_v44 = vld [vmem:[#allocation10 + $0x28] sm:$0xf0]  ;;  %v890_v45 = vld [vmem:[#allocation10 + $0x10] sm:$0xf]  ;;  %v1147_v46 = vld [vmem:[#allocation10 + $0x14] sm:$0xf0] }
  0x32   :  { %352 = vmatpush.bf16.msra.mxu1 %v923_v20  ;;  %v903_v47 = vor.u32 %v1148_v42, %v900_v44  ;;  %v1146_v48 = vld [vmem:[#allocation10 + $0x14] sm:$0xf]  ;;  %v892_v49 = vld [vmem:[#allocation10 + $0x18] sm:$0xf0]  ;;  %v891_v50 = vor.u32 %v1147_v46, %v890_v45  ;;  %v882_v52 = vld [vmem:[#allocation10] sm:$0xf] }
  0x33   :  { %233 = vmatpush.bf16.msra.mxu0 %v1140_v19  ;;  %365 = vmatpush.bf16.msra.mxu2 %v927_v21  ;;  %v895_v51 = vor.u32 %v1146_v48, %v892_v49  ;;  %v1145_v53 = vld [vmem:[#allocation10 + $0x4] sm:$0xf0]  ;;  %v1144_v54 = vld [vmem:[#allocation10 + $0x4] sm:$0xf]  ;;  %v884_v55 = vld [vmem:[#allocation10 + $0x8] sm:$0xf0] }
  0x34   :  { %v883_v56 = vor.u32 %v1145_v53, %v882_v52  ;;  %v887_v57 = vor.u32 %v1144_v54, %v884_v55  ;;  %v1002_v58 = vld [vmem:[#allocation15 + $0x70] sm:$0xf]  ;;  %v1175_v59 = vld [vmem:[#allocation15 + $0x74] sm:$0xf0]  ;;  %v1174_v60 = vld [vmem:[#allocation15 + $0x74] sm:$0xf] }
  0x35   :  { %v1003_v61 = vor.u32 %v1175_v59, %v1002_v58  ;;  %v1004_v62 = vld [vmem:[#allocation15 + $0x78] sm:$0xf0]  ;;  %v994_v63 = vld [vmem:[#allocation15 + $0x60] sm:$0xf]  ;;  %v1173_v0 = vld [vmem:[#allocation15 + $0x64] sm:$0xf0] }
  0x36   :  { %353 = vmatpush.bf16.msra.mxu1 %v915_v31  ;;  %v1007_v1 = vor.u32 %v1174_v60, %v1004_v62  ;;  %v1172_v2 = vld [vmem:[#allocation15 + $0x64] sm:$0xf]  ;;  %v996_v3 = vld [vmem:[#allocation15 + $0x68] sm:$0xf0]  ;;  %v1066_v4 = vld [vmem:[#allocation15 + $0xf0] sm:$0xf]  ;;  %v995_v5 = vor.u32 %v1173_v0, %v994_v63 }
  0x37   :  { %234 = vmatpush.bf16.msra.mxu0 %v1139_v22  ;;  %366 = vmatpush.bf16.msra.mxu2 %v919_v33  ;;  %v1191_v6 = vld [vmem:[#allocation15 + $0xf4] sm:$0xf0]  ;;  %v1190_v7 = vld [vmem:[#allocation15 + $0xf4] sm:$0xf]  ;;  %v1068_v8 = vld [vmem:[#allocation15 + $0xf8] sm:$0xf0]  ;;  %v999_v9 = vor.u32 %v1172_v2, %v996_v3 }
  0x38   :  { %583 = vmatpush.bf16.msra.mxu3 %v1003_v61  ;;  %v1067_v10 = vor.u32 %v1191_v6, %v1066_v4  ;;  %v1071_v11 = vor.u32 %v1190_v7, %v1068_v8  ;;  %v986_v12 = vld [vmem:[#allocation15 + $0x50] sm:$0xf]  ;;  %v1171_v13 = vld [vmem:[#allocation15 + $0x54] sm:$0xf0]  ;;  %v1170_v14 = vld [vmem:[#allocation15 + $0x54] sm:$0xf] }
  0x39   :  { %v988_v15 = vld [vmem:[#allocation15 + $0x58] sm:$0xf0]  ;;  %v1058_v16 = vld [vmem:[#allocation15 + $0xe0] sm:$0xf]  ;;  %v1189_v17 = vld [vmem:[#allocation15 + $0xe4] sm:$0xf0]  ;;  %v987_v22 = vor.u32 %v1171_v13, %v986_v12 }
  0x3a   :  { %354 = vmatpush.bf16.msra.mxu1 %v907_v37  ;;  %v1059_v18 = vor.u32 %v1189_v17, %v1058_v16  ;;  %v1188_v19 = vld [vmem:[#allocation15 + $0xe4] sm:$0xf]  ;;  %v1060_v20 = vld [vmem:[#allocation15 + $0xe8] sm:$0xf0]  ;;  %v1222_v21 = vld [vmem:[#allocation9] ss:$0 sm:$0xff]  ;;  %v991_v26 = vor.u32 %v1170_v14, %v988_v15  ;;  %v1605_v37 = vstv %s159_s10 }
  0x3b   :  { %235 = vmatpush.bf16.msra.mxu0 %v1138_v23  ;;  %367 = vmatpush.bf16.msra.mxu2 %v911_v39  ;;  %v1063_v23 = vor.u32 %v1188_v19, %v1060_v20  ;;  %v1187_v28 = vld [vmem:[#allocation15 + $0xd4] sm:$0xf0]  ;;  %v1186_v29 = vld [vmem:[#allocation15 + $0xd4] sm:$0xf]  ;;  %v1168_v30 = vld [vmem:[#allocation15 + $0x44] sm:$0xf] }
  0x3c   :  { %584 = vmatpush.bf16.msra.mxu3 %v995_v5  ;;  %v980_v31 = vld [vmem:[#allocation15 + $0x48] sm:$0xf0]  ;;  %v1052_v32 = vld [vmem:[#allocation15 + $0xd8] sm:$0xf0]  ;;  %v1042_v35 = vld [vmem:[#allocation15 + $0xc0] sm:$0xf] }
  0x3d   :  { %v1055_v34 = vor.u32 %v1186_v29, %v1052_v32  ;;  %v1185_v39 = vld [vmem:[#allocation15 + $0xc4] sm:$0xf0]  ;;  %v1184_v40 = vld [vmem:[#allocation15 + $0xc4] sm:$0xf]  ;;  %v1044_v41 = vld [vmem:[#allocation15 + $0xc8] sm:$0xf0] }
  0x3e   :  { %355 = vmatpush.bf16.msra.mxu1 %v899_v43  ;;  %v983_v43 = vor.u32 %v1168_v30, %v980_v31  ;;  %v970_v44 = vld [vmem:[#allocation15 + $0x30] sm:$0xf]  ;;  %v1167_v45 = vld [vmem:[#allocation15 + $0x34] sm:$0xf0]  ;;  %v1166_v46 = vld [vmem:[#allocation15 + $0x34] sm:$0xf]  ;;  %v1043_v49 = vor.u32 %v1185_v39, %v1042_v35 }
  0x3f   :  { %236 = vmatpush.bf16.msra.mxu0 %v1137_v24  ;;  %368 = vmatpush.bf16.msra.mxu2 %v903_v47  ;;  %v978_v24 = vld [vmem:[#allocation15 + $0x40] sm:$0xf]  ;;  %v972_v47 = vld [vmem:[#allocation15 + $0x38] sm:$0xf0]  ;;  %v1165_v54 = vld [vmem:[#allocation15 + $0x24] sm:$0xf0] }
  0x40   :  { %585 = vmatpush.bf16.msra.mxu3 %v987_v22  ;;  %v975_v52 = vor.u32 %v1166_v46, %v972_v47  ;;  %v962_v53 = vld [vmem:[#allocation15 + $0x20] sm:$0xf]  ;;  %v1164_v55 = vld [vmem:[#allocation15 + $0x24] sm:$0xf]  ;;  %v1034_v63 = vld [vmem:[#allocation15 + $0xb0] sm:$0xf] }
  0x41   :  { %v963_v58 = vor.u32 %v1165_v54, %v962_v53  ;;  %v1183_v0 = vld [vmem:[#allocation15 + $0xb4] sm:$0xf0]  ;;  %v1036_v3 = vld [vmem:[#allocation15 + $0xb8] sm:$0xf0]  ;;  %v954_v5 = vld [vmem:[#allocation15 + $0x10] sm:$0xf] }
  0x42   :  { %356 = vmatpush.bf16.msra.mxu1 %v891_v50  ;;  %v1047_v50 = vor.u32 %v1184_v40, %v1044_v41  ;;  %v1035_v2 = vor.u32 %v1183_v0, %v1034_v63  ;;  %v1163_v6 = vld [vmem:[#allocation15 + $0x14] sm:$0xf0]  ;;  %v1162_v7 = vld [vmem:[#allocation15 + $0x14] sm:$0xf]  ;;  %v1180_v14 = vld [vmem:[#allocation15 + $0xa4] sm:$0xf] }
  0x43   :  { %237 = vmatpush.bf16.msra.mxu0 %v1136_v25  ;;  %369 = vmatpush.bf16.msra.mxu2 %v895_v51  ;;  %v1169_v25 = vld [vmem:[#allocation15 + $0x44] sm:$0xf0]  ;;  %v971_v51 = vor.u32 %v1167_v45, %v970_v44  ;;  %v955_v8 = vor.u32 %v1163_v6, %v954_v5  ;;  %v1028_v15 = vld [vmem:[#allocation15 + $0xa8] sm:$0xf0]  ;;  %v946_v17 = vld [vmem:[#allocation15] sm:$0xf] }
  0x44   :  { %v979_v38 = vor.u32 %v1169_v25, %v978_v24  ;;  %v1031_v16 = vor.u32 %v1180_v14, %v1028_v15  ;;  %v1160_v19 = vld [vmem:[#allocation15 + $0x4] sm:$0xf]  ;;  %v1018_v22 = vld [vmem:[#allocation15 + $0x90] sm:$0xf]  ;;  %v1010_v29 = vld [vmem:[#allocation15 + $0x80] sm:$0xf] }
  0x45   :  { %v1177_v30 = vld [vmem:[#allocation15 + $0x84] sm:$0xf0]  ;;  %v1176_v31 = vld [vmem:[#allocation15 + $0x84] sm:$0xf]  ;;  %v1199_v35 = vld [vmem:[#allocation12 + $0x38] sm:$0xff]  ;;  %s157_s23 = sadd.f32 0.5, %s156_s19 }
  0x46   :  { %238 = vmatmul.bf16.vlgmr.msra.gmra.mxu0 %v161_v27  ;;  %357 = vmatpush.bf16.msra.mxu1 %v883_v56  ;;  %v1050_v27 = vld [vmem:[#allocation15 + $0xd0] sm:$0xf]  ;;  %v964_v56 = vld [vmem:[#allocation15 + $0x28] sm:$0xf0]  ;;  %v1011_v32 = vor.u32 %v1177_v30, %v1010_v29  ;;  %v1196_v39 = vld [vmem:[#allocation12 + $0x20] sm:$0xff] }
  0x47   :  { %370 = vmatpush.bf16.msra.mxu2 %v887_v57  ;;  %596 = vmatpush.bf16.msrb.mxu0 %v1067_v10  ;;  %v1051_v33 = vor.u32 %v1187_v28, %v1050_v27  ;;  %v967_v59 = vor.u32 %v1164_v55, %v964_v56  ;;  %v1026_v10 = vld [vmem:[#allocation15 + $0xa0] sm:$0xf]  ;;  %v1020_v27 = vld [vmem:[#allocation15 + $0x98] sm:$0xf0]  ;;  %v264_v40 = vld [vmem:[%s1636_s5] sm:$0x3] }
  0x48   :  { %586 = vmatpush.bf16.msra.mxu3 %v979_v38  ;;  %v1197_v38 = vld [vmem:[#allocation12 + $0x28] sm:$0xff]  ;;  %v266_v41 = vperm.slane %v264_v40, 0  ;;  %v267_v46 = vperm.slane %v264_v40, 1  ;;  %v417_v63 = vld [vmem:[%s1642_s11] sm:$0x3] }
  0x49   :  { %v419_v0 = vperm.slane %v417_v63, 0  ;;  %v1205_v15 = vld [vmem:[#allocation13 + $0x28] sm:$0xff] }
  0x4a   :  { %609 = vmatpush.bf16.msrb.mxu1 %v1007_v1  ;;  %v1182_v1 = vld [vmem:[#allocation15 + $0xb4] sm:$0xf] }
  0x4b   :  { %622 = vmatpush.bf16.msrb.mxu2 %v1071_v11  ;;  %597 = vmatpush.bf16.msrb.mxu0 %v1059_v18  ;;  %v1039_v4 = vor.u32 %v1182_v1, %v1036_v3  ;;  %v1181_v11 = vld [vmem:[#allocation15 + $0xa4] sm:$0xf0] }
  0x4c   :  { %587 = vmatpush.bf16.msra.mxu3 %v971_v51  ;;  %v1027_v13 = vor.u32 %v1181_v11, %v1026_v10  ;;  %v1161_v18 = vld [vmem:[#allocation15 + $0x4] sm:$0xf0] }
  0x4d   :  { %v947_v20 = vor.u32 %v1161_v18, %v946_v17  ;;  %v1203_v17 = vld [vmem:[#allocation13 + $0x18] sm:$0xff]  ;;  %v1202_v18 = vld [vmem:[#allocation13 + $0x10] sm:$0xff] }
  0x4e   :  { %610 = vmatpush.bf16.msrb.mxu1 %v999_v9  ;;  %v956_v9 = vld [vmem:[#allocation15 + $0x18] sm:$0xf0] }
  0x4f   :  { %623 = vmatpush.bf16.msrb.mxu2 %v1063_v23  ;;  %598 = vmatpush.bf16.msrb.mxu0 %v1051_v33  ;;  %v959_v12 = vor.u32 %v1162_v7, %v956_v9  ;;  %v1179_v23 = vld [vmem:[#allocation15 + $0x94] sm:$0xf0]  ;;  %v1012_v33 = vld [vmem:[#allocation15 + $0x88] sm:$0xf0] }
  0x50   :  { %588 = vmatpush.bf16.msra.mxu3 %v963_v58  ;;  %v1019_v25 = vor.u32 %v1179_v23, %v1018_v22  ;;  %v1194_v58 = vld [vmem:[#allocation12 + $0x10] sm:$0xff] }
  0x52   :  { %611 = vmatpush.bf16.msrb.mxu1 %v991_v26  ;;  %v1178_v26 = vld [vmem:[#allocation15 + $0x94] sm:$0xf] }
  0x53   :  { %624 = vmatpush.bf16.msrb.mxu2 %v1055_v34  ;;  %599 = vmatpush.bf16.msrb.mxu0 %v1043_v49  ;;  %v1023_v28 = vor.u32 %v1178_v26, %v1020_v27  ;;  %v1015_v34 = vor.u32 %v1176_v31, %v1012_v33  ;;  %v1224_v31 = vld [vmem:[%s1640_s9] ss:$0 sm:$0xff] }
  0x54   :  { %589 = vmatpush.bf16.msra.mxu3 %v955_v8 }
  0x56   :  { %612 = vmatpush.bf16.msrb.mxu1 %v983_v43  ;;  %v1611_v43 = vstv %s157_s23 }
  0x57   :  { %625 = vmatpush.bf16.msrb.mxu2 %v1047_v50  ;;  %600 = vmatpush.bf16.msrb.mxu0 %v1035_v2  ;;  %v420_v2 = vperm.slane %v417_v63, 1 }
  0x58   :  { %590 = vmatpush.bf16.msra.mxu3 %v947_v20  ;;  %v1200_v20 = vld [vmem:[#allocation13] sm:$0xff] }
  0x5a   :  { %613 = vmatpush.bf16.msrb.mxu1 %v975_v52 }
  0x5b   :  { %626 = vmatpush.bf16.msrb.mxu2 %v1039_v4  ;;  %601 = vmatpush.bf16.msrb.mxu0 %v1027_v13 }
  0x5c   :  { %705 = vmatpush.bf16.msrb.mxu3 %v1199_v35 }
  0x5e   :  { %614 = vmatpush.bf16.msrb.mxu1 %v967_v59  ;;  %v1193_v59 = vld [vmem:[#allocation12 + $0x8] sm:$0xff] }
  0x5f   :  { %627 = vmatpush.bf16.msrb.mxu2 %v1031_v16  ;;  %602 = vmatpush.bf16.msrb.mxu0 %v1019_v25  ;;  %v1204_v16 = vld [vmem:[#allocation13 + $0x20] sm:$0xff] }
  0x62   :  { %615 = vmatpush.bf16.msrb.mxu1 %v959_v12 }
  0x63   :  { %628 = vmatpush.bf16.msrb.mxu2 %v1023_v28  ;;  %603 = vmatpush.bf16.msrb.mxu0 %v1011_v32 }
  0x67   :  { %629 = vmatpush.bf16.msrb.mxu2 %v1015_v34 }
  0xc3   :  { %v239_v36 = vpop.f32.mrf.mxu0 }
  0xc4   :  { %v240_v42 = vadd.f32 %v1222_v21, %v239_v36  ;;  %v948_v21 = vld [vmem:[#allocation15 + $0x8] sm:$0xf0]  ;;  %v1198_v36 = vld [vmem:[#allocation12 + $0x30] sm:$0xff] }
  0xc5   :  { %v951_v24 = vor.u32 %v1160_v19, %v948_v21  ;;  %706 = vmatpush.bf16.msrb.mxu3 %v1198_v36  ;;  %v1201_v19 = vld [vmem:[#allocation13 + $0x8] sm:$0xff]  ;;  %v1223_v21 = vld [vmem:[%s1638_s7] ss:$0 sm:$0xff]  ;;  %s818_s7 = sshll.u32 %s1643_s12, 4  ;;  %s819_s7 = int_to_ptr.hbm [resolvable:$true] %s818_s7 }
  0xc6   :  { %v244_v48 = vmul.f32 %v1605_v37, %v240_v42 }
  0xc7   :  { %616 = vmatpush.bf16.msrb.mxu1 %v951_v24 }
  0xc8   :  { %1225 = vtanh.f32 %v244_v48 }
  0xc9   :  { %707 = vmatpush.bf16.msrb.mxu3 %v1197_v38 }
  0xcb   :  { %v241_v57 = vpop.f32.mrf.mxu0 }
  0xcc   :  { %v1195_v57 = vld [vmem:[#allocation12 + $0x18] sm:$0xff] }
  0xcd   :  { %708 = vmatpush.bf16.msrb.mxu3 %v1196_v39 }
  0xce   :  { %v1226_v60 = vpop.eup %1225 }
  0xcf   :  { %1227 = vtanh.f32 %v1226_v60  ;;  %v1192_v60 = vld [vmem:[#allocation12] sm:$0xff] }
  0xd1   :  { %709 = vmatpush.bf16.msrb.mxu3 %v1195_v57 }
  0xd5   :  { %v1228_v61 = vpop.eup %1227  ;;  %710 = vmatpush.bf16.msrb.mxu3 %v1194_v58 }
  0xd6   :  { %v247_v62 = vpack.c.bf16 %v1228_v61, %v1228_v61  ;;  %v1207_v61 = vld [vmem:[#allocation13 + $0x38] sm:$0xff] }
  0xd7   :  { %791 = vmatpush.bf16.msra.mxu0 %v1207_v61 }
  0xd8   :  { %358 = vmatmul.bf16.vlgmr.msra.gmra.mxu1 %v247_v62  ;;  %371 = vmatmul.bf16.vlgmr.msra.gmra.mxu2 %v247_v62  ;;  %v1206_v62 = vld [vmem:[#allocation13 + $0x30] sm:$0xff] }
  0xd9   :  { %711 = vmatpush.bf16.msrb.mxu3 %v1193_v59 }
  0xdb   :  { %792 = vmatpush.bf16.msra.mxu0 %v1206_v62 }
  0xdd   :  { %712 = vmatpush.bf16.msrb.mxu3 %v1192_v60 }
  0xdf   :  { %793 = vmatpush.bf16.msra.mxu0 %v1205_v15 }
  0xe3   :  { %794 = vmatpush.bf16.msra.mxu0 %v1204_v16 }
  0xe7   :  { %795 = vmatpush.bf16.msra.mxu0 %v1203_v17 }
  0xeb   :  { %796 = vmatpush.bf16.msra.mxu0 %v1202_v18 }
  0xef   :  { %797 = vmatpush.bf16.msra.mxu0 %v1201_v19 }
  0xf3   :  { %798 = vmatpush.bf16.msra.mxu0 %v1200_v20 }
 0x155   :  { %v359_v42 = vpop.f32.mrf.mxu1 }
 0x156   :  { %v360_v44 = vadd.f32 %v359_v42, %v266_v41 }
 0x158   :  { %v377_v45 = vmul.f32 %v1611_v43, %v360_v44 }
 0x15a   :  { %vm378_vm0 = vcmp.ge.f32.partialorder %v377_v45, 0.0  ;;  %v379_v47 = vmul.f32 0.1, %v377_v45 }
 0x15b   :  { %v372_v48 = vpop.f32.mrf.mxu2 }
 0x15c   :  { %v373_v49 = vadd.f32 %v372_v48, %v267_v46  ;;  %v380_v50 = vsel %vm378_vm0, %v377_v45, %v379_v47 }
 0x15d   :  { %v361_v51 = vpop.f32.mrf.mxu1  ;;  %v383_v52 = vpack.c.bf16 %v380_v50, %v380_v50 }
 0x15e   :  { %v381_v53 = vmul.f32 %v373_v49, %v1605_v37 }
 0x15f   :  { %591 = vmatmul.bf16.vlgmr.msra.gmra.mxu3 %v383_v52  ;;  %617 = vmatmul.bf16.vlgmr.msrb.gmra.mxu1 %v383_v52 }
 0x160   :  { %v382_v54 = vmax.f32 %v381_v53, 0.0 }
 0x162   :  { %v384_v55 = vpack.c.bf16 %v382_v54, %v382_v54 }
 0x163   :  { %v374_v56 = vpop.f32.mrf.mxu2 }
 0x164   :  { %604 = vmatmul.bf16.vlgmr.msrb.gmra.mxu0 %v384_v55  ;;  %630 = vmatmul.bf16.vlgmr.msrb.gmra.mxu2 %v384_v55 }
 0x1dc   :  { %v618_v37 = vpop.f32.mrf.mxu1 }
 0x1dd   :  { %v619_v7 = vadd.f32 %v618_v37, %v420_v2 }
 0x1e1   :  { %v605_v1 = vpop.f32.mrf.mxu0 }
 0x1e2   :  { %v592_v3 = vpop.f32.mrf.mxu3 }
 0x1e3   :  { %v593_v4 = vadd.f32 %v592_v3, %v419_v0 }
 0x1e4   :  { %v620_v5 = vpop.f32.mrf.mxu1 }
 0x1e5   :  { %v606_v6 = vadd.f32 %v605_v1, %v593_v4 }
 0x1e7   :  { %v631_v8 = vpop.f32.mrf.mxu2  ;;  %v635_v9 = vadd.f32 %v606_v6, %v382_v54 }
 0x1e8   :  { %v632_v10 = vadd.f32 %v631_v8, %v619_v7 }
 0x1e9   :  { %v607_v11 = vpop.f32.mrf.mxu0  ;;  %v636_v12 = vpack.c.bf16 %v635_v9, %v635_v9 }
 0x1ea   :  { %v594_v13 = vpop.f32.mrf.mxu3 }
 0x1eb   :  { %713 = vmatmul.bf16.vlgmr.msrb.gmra.mxu3 %v636_v12 }
 0x1ef   :  { %v633_v14 = vpop.f32.mrf.mxu2 }
 0x26e   :  { %v714_v22 = vpop.f32.mrf.mxu3 }
 0x26f   :  { %v715_v23 = vadd.f32 %v1223_v21, %v714_v22 }
 0x271   :  { %v718_v24 = vmul.f32 %v715_v23, %v1611_v43 }
 0x273   :  { %1229 = vtanh.f32 %v718_v24 }
 0x276   :  { %v716_v25 = vpop.f32.mrf.mxu3 }
 0x279   :  { %v1230_v26 = vpop.eup %1229 }
 0x27a   :  { %1231 = vtanh.f32 %v1230_v26 }
 0x280   :  { %v1232_v27 = vpop.eup %1231 }
 0x281   :  { %v721_v28 = vadd.f32 %v1232_v27, %v632_v10  ;;  %1233 = vtanh.f32 %v1232_v27 }
 0x283   :  { %v722_v29 = vpack.c.bf16 %v721_v28, %v721_v28 }
 0x285   :  { %799 = vmatmul.bf16.vlgmr.msra.gmra.mxu0 %v722_v29 }
 0x287   :  { %v1234_v30 = vpop.eup %1233 }
 0x288   :  { %809 = vst [vmem:[#allocation16] sm:$0xff] %v1234_v30 }
 0x289   :  { %821 = dma.vmem_to_hbm [thread:$0]  %s817_s15, 128, %s819_s7, [#allocation6]  }
 0x302   :  { %v800_v32 = vpop.f32.mrf.mxu0 }
 0x303   :  { %v801_v33 = vadd.f32 %v1224_v31, %v800_v32 }
 0x305   :  { %v804_v34 = vmul.f32 0.5, %v801_v33 }
 0x307   :  { %1235 = vtanh.f32 %v804_v34 }
 0x30a   :  { %v802_v35 = vpop.f32.mrf.mxu0 }
 0x30d   :  { %v1236_v36 = vpop.eup %1235 }
 0x30e   :  { %v806_v38 = vadd.f32 1.0, %v1236_v36 }
 0x310   :  { %v807_v39 = vmul.f32 0.5, %v806_v38 }
 0x312   :  { %810 = vst [vmem:[#allocation17] sm:$0xff] %v807_v39 }
 0x313   :  { %832 = dma.vmem_to_hbm [thread:$0]  %s828_s21, 128, %s830_s24, [#allocation18]  }
 0x314   :  { %1475 = dma.done.wait [#allocation6], 128  }
 0x315   :  { %1476 = vsyncadd [#allocation6], 4294967168 }
 0x316   :  { %1477 = dma.done.wait [#allocation18], 128  }
 0x317   :  { %1478 = vsyncadd [#allocation18], 4294967168 }
 0x318   :  { %841 = vsyncpa [#allocation5], 1 }
 0x319   :  { %842 = vsyncpa [#allocation8], 1 }
 0x31a   :  { %843 = vsyncpa [#allocation11], 1 }
 0x31b   :  { %844 = vsyncpa [#allocation14], 1 }
 0x31c   :  { %845 = vsyncpa [#allocation6], 1 }
 0x31d   :  { %846 = vsyncpa [#allocation18], 1 }

// kernel: tpu_custom_call.1
= control target key start
LH: loop header
LB: loop body
LE: loop exit
PB: predicated region body
PF: predicated region fallthrough
CT: control target
= control target key end

     0   :  { %s1479_s28 = smov [#allocation3]   ;;  %s1631_s0 = inlined_call_operand.hbm [shape: f32[2], index: 0, kind: input, shape index: {}]   ;;  %s1632_s1 = inlined_call_operand.hbm [shape: f32[8,128], index: 1, kind: input, shape index: {}]   ;;  %s1633_s2 = inlined_call_operand.hbm [shape: bf16[128,128], index: 2, kind: input, shape index: {}]   ;;  %s1634_s3 = inlined_call_operand.hbm [shape: f32[1,128], index: 3, kind: input, shape index: {}]   ;;  %s1635_s4 = inlined_call_operand.hbm [shape: bf16[128,256], index: 4, kind: input, shape index: {}]   ;;  %s1636_s5 = inlined_call_operand.vmem [shape: f32[1,256], index: 5, kind: input, shape index: {}]   ;;  %s1637_s6 = inlined_call_operand.hbm [shape: bf16[128,128], index: 6, kind: input, shape index: {}]   ;;  %s1638_s7 = inlined_call_operand.vmem [shape: f32[1,128], index: 7, kind: input, shape index: {}]   ;;  %s1639_s8 = inlined_call_operand.hbm [shape: bf16[128,128], index: 8, kind: input, shape index: {}]   ;;  %s1640_s9 = inlined_call_operand.vmem [shape: f32[1,128], index: 9, kind: input, shape index: {}]   ;;  %s1641_s10 = inlined_call_operand.hbm [shape: bf16[256,256], index: 10, kind: input, shape index: {}]   ;;  %s1642_s11 = inlined_call_operand.vmem [shape: f32[1,256], index: 11, kind: input, shape index: {}]   ;;  %s1643_s12 = inlined_call_operand.hbm [shape: f32[8,128], index: 12, kind: output, shape index: {0}]   ;;  %s1644_s13 = inlined_call_operand.hbm [shape: f32[8,128], index: 13, kind: output, shape index: {1}]  }
   0x1   :  { %s20_s27 = sshll.u32 %s1631_s0, 4  ;;  %s21_s27 = int_to_ptr.hbm [resolvable:$true] %s20_s27 }
   0x2   :  { %23 = dma.hbm_to_smem %s21_s27, 16, %s1479_s28, [#allocation2] }
   0x3   :  { %1465 = dma.done.wait [#allocation2], 16 }
   0x4   :  { %1466 = vsyncadd [#allocation2], 4294967280 }
   0x5   :  { %26 = sfence }
   0x6   :  { %27 = vsyncpa [#allocation5], 0 }
   0x7   :  { %28 = vsyncpa [#allocation8], 0 }
   0x8   :  { %29 = vsyncpa [#allocation11], 0 }
   0x9   :  { %30 = vsyncpa [#allocation14], 0 }
   0xa   :  { %31 = vsyncpa [#allocation6], 0  ;;  %s48_s14 = sshll.u32 %s1633_s2, 4  ;;  %s49_s14 = int_to_ptr.hbm [resolvable:$true] %s48_s14 }
   0xb   :  { %32 = vsyncpa [#allocation18], 0  ;;  %s1480_s15 = smov [#allocation7]   ;;  %s72_s18 = sshll.u32 %s1635_s4, 4  ;;  %s73_s18 = int_to_ptr.hbm [resolvable:$true] %s72_s18 }
   0xc   :  { %s50_s16 = sshll.u32 %s1480_s15, 4  ;;  %s1481_s19 = smov 64   ;;  %s51_s16 = int_to_ptr.vmem [resolvable:$true] %s50_s16 }
   0xd   :  { %s1482_s20 = smov 4   ;;  %s1483_s21 = smov [#allocation10]  }
   0xe   :  { %56 = dma.hbm_to_vmem [thread:$0]  %s49_s14, 1024, %s51_s16, [#allocation8], %s1481_s19, %s1481_s19, %s1482_s20  }
   0xf   :  { %s74_s22 = sshll.u32 %s1483_s21, 4  ;;  %s1484_s2 = smov 128   ;;  %s75_s22 = int_to_ptr.vmem [resolvable:$true] %s74_s22 }
  0x10   :  { %s1485_s23 = smov 8   ;;  %s102_s4 = sshll.u32 %s1639_s8, 4  ;;  %s103_s4 = int_to_ptr.hbm [resolvable:$true] %s102_s4 }
  0x11   :  { %80 = dma.hbm_to_vmem [thread:$0]  %s73_s18, 2048, %s75_s22, [#allocation11], %s1484_s2, %s1484_s2, %s1485_s23  }
  0x12   :  { %s1486_s26 = smov [#allocation13]   ;;  %s38_s30 = sshll.u32 %s1632_s1, 4  ;;  %s39_s30 = int_to_ptr.hbm [resolvable:$true] %s38_s30 }
  0x13   :  { %s104_s27 = sshll.u32 %s1486_s26, 4  ;;  %s1487_s14 = smov [#allocation4]   ;;  %s105_s27 = int_to_ptr.vmem [resolvable:$true] %s104_s27 }
  0x14   :  { %110 = dma.hbm_to_vmem [thread:$0]  %s103_s4, 1024, %s105_s27, [#allocation14], %s1481_s19, %s1481_s19, %s1482_s20  }
  0x15   :  { %s40_s15 = sshll.u32 %s1487_s14, 4  ;;  %s62_s17 = sshll.u32 %s1634_s3, 4  ;;  %s41_s15 = int_to_ptr.vmem [resolvable:$true] %s40_s15  ;;  %s63_s17 = int_to_ptr.hbm [resolvable:$true] %s62_s17 }
  0x16   :  { %43 = dma.hbm_to_vmem [thread:$0]  %s39_s30, 128, %s41_s15, [#allocation5]  }
  0x17   :  { %s87_s21 = sshll.u32 %s1637_s6, 4  ;;  %s1488_s22 = smov [#allocation9]   ;;  %s88_s21 = int_to_ptr.hbm [resolvable:$true] %s87_s21 }
  0x18   :  { %s64_s1 = sshll.u32 %s1488_s22, 4  ;;  %s1489_s24 = smov [#allocation12]   ;;  %s65_s1 = int_to_ptr.vmem [resolvable:$true] %s64_s1 }
  0x19   :  { %67 = dma.hbm_to_vmem [thread:$0]  %s63_s17, 16, %s65_s1, [#allocation8]  }
  0x1a   :  { %s89_s25 = sshll.u32 %s1489_s24, 4  ;;  %s117_s27 = sshll.u32 %s1641_s10, 4  ;;  %s90_s25 = int_to_ptr.vmem [resolvable:$true] %s89_s25  ;;  %s118_s27 = int_to_ptr.hbm [resolvable:$true] %s117_s27 }
  0x1b   :  { %95 = dma.hbm_to_vmem [thread:$0]  %s88_s21, 1024, %s90_s25, [#allocation11], %s1481_s19, %s1481_s19, %s1482_s20  }
  0x1c   :  { %s1490_s3 = smov [#allocation15]  }
  0x1d   :  { %s119_s28 = sshll.u32 %s1490_s3, 4  ;;  %s120_s28 = int_to_ptr.vmem [resolvable:$true] %s119_s28 }
  0x1e   :  { %125 = dma.hbm_to_vmem [thread:$0]  %s118_s27, 4096, %s120_s28, [#allocation14], %s1484_s2, %s1484_s2, %s1485_s23  }
  0x1f   :  { %1467 = dma.done.wait [#allocation5], 128  }
  0x20   :  { %1468 = vsyncadd [#allocation5], 4294967168 }
  0x21   :  { %1469 = dma.done.wait [#allocation8], 1040  }
  0x22   :  { %1470 = vsyncadd [#allocation8], 4294966256 }
  0x23   :  { %1471 = dma.done.wait [#allocation11], 3072  }
  0x24   :  { %1472 = vsyncadd [#allocation11], 4294964224 }
  0x25   :  { %1473 = dma.done.wait [#allocation14], 5120  }
  0x26   :  { %1474 = vsyncadd [#allocation14], 4294962176  ;;  %v1143_v0 = vld [vmem:[#allocation7 + $0x38] sm:$0xff]  ;;  %v1142_v1 = vld [vmem:[#allocation7 + $0x30] sm:$0xff]  ;;  %s1602_s6 = sld [smem:[#allocation3 + $0x1]]  ;;  %s1491_s14 = smov [#allocation16]  }
  0x27   :  { %230 = vmatpush.bf16.msra.mxu0 %v1143_v0  ;;  %v938_v2 = vld [vmem:[#allocation10 + $0x70] sm:$0xf]  ;;  %v1159_v3 = vld [vmem:[#allocation10 + $0x74] sm:$0xf0]  ;;  %v1158_v4 = vld [vmem:[#allocation10 + $0x74] sm:$0xf] }
  0x28   :  { %v939_v5 = vor.u32 %v1159_v3, %v938_v2  ;;  %v940_v6 = vld [vmem:[#allocation10 + $0x78] sm:$0xf0]  ;;  %v930_v7 = vld [vmem:[#allocation10 + $0x60] sm:$0xf]  ;;  %v1157_v8 = vld [vmem:[#allocation10 + $0x64] sm:$0xf0] }
  0x29   :  { %v943_v9 = vor.u32 %v1158_v4, %v940_v6  ;;  %v1156_v10 = vld [vmem:[#allocation10 + $0x64] sm:$0xf]  ;;  %v932_v11 = vld [vmem:[#allocation10 + $0x68] sm:$0xf0]  ;;  %v931_v13 = vor.u32 %v1157_v8, %v930_v7  ;;  %v922_v14 = vld [vmem:[#allocation10 + $0x50] sm:$0xf] }
  0x2a   :  { %v1141_v12 = vld [vmem:[#allocation7 + $0x28] sm:$0xff]  ;;  %350 = vmatpush.bf16.msra.mxu1 %v939_v5  ;;  %v935_v15 = vor.u32 %v1156_v10, %v932_v11  ;;  %v1155_v16 = vld [vmem:[#allocation10 + $0x54] sm:$0xf0]  ;;  %v1154_v17 = vld [vmem:[#allocation10 + $0x54] sm:$0xf]  ;;  %s156_s19 = sld [smem:[#allocation3]] }
  0x2b   :  { %231 = vmatpush.bf16.msra.mxu0 %v1142_v1  ;;  %363 = vmatpush.bf16.msra.mxu2 %v943_v9  ;;  %v924_v18 = vld [vmem:[#allocation10 + $0x58] sm:$0xf0]  ;;  %v923_v20 = vor.u32 %v1155_v16, %v922_v14  ;;  %v1138_v23 = vld [vmem:[#allocation7 + $0x10] sm:$0xff]  ;;  %v1137_v24 = vld [vmem:[#allocation7 + $0x8] sm:$0xff]  ;;  %s816_s15 = sshll.u32 %s1491_s14, 4  ;;  %s1492_s18 = smov [#allocation17]   ;;  %s817_s15 = int_to_ptr.vmem [resolvable:$true] %s816_s15 }
  0x2c   :  { %v1140_v19 = vld [vmem:[#allocation7 + $0x20] sm:$0xff]  ;;  %v927_v21 = vor.u32 %v1154_v17, %v924_v18  ;;  %v1139_v22 = vld [vmem:[#allocation7 + $0x18] sm:$0xff]  ;;  %v1153_v29 = vld [vmem:[#allocation10 + $0x44] sm:$0xf0]  ;;  %s159_s10 = sadd.f32 0.5, %s1602_s6  ;;  %s827_s21 = sshll.u32 %s1492_s18, 4  ;;  %s828_s21 = int_to_ptr.vmem [resolvable:$true] %s827_s21 }
  0x2d   :  { %v1136_v25 = vld [vmem:[#allocation7] sm:$0xff]  ;;  %v160_v26 = vld [vmem:[#allocation4] sm:$0xff]  ;;  %v916_v32 = vld [vmem:[#allocation10 + $0x48] sm:$0xf0]  ;;  %s829_s24 = sshll.u32 %s1644_s13, 4  ;;  %s830_s24 = int_to_ptr.hbm [resolvable:$true] %s829_s24 }
  0x2e   :  { %351 = vmatpush.bf16.msra.mxu1 %v931_v13  ;;  %v161_v27 = vpack.c.bf16 %v160_v26, %v160_v26  ;;  %v914_v28 = vld [vmem:[#allocation10 + $0x40] sm:$0xf]  ;;  %v1152_v30 = vld [vmem:[#allocation10 + $0x44] sm:$0xf]  ;;  %v906_v34 = vld [vmem:[#allocation10 + $0x30] sm:$0xf] }
  0x2f   :  { %232 = vmatpush.bf16.msra.mxu0 %v1141_v12  ;;  %364 = vmatpush.bf16.msra.mxu2 %v935_v15  ;;  %v915_v31 = vor.u32 %v1153_v29, %v914_v28  ;;  %v919_v33 = vor.u32 %v1152_v30, %v916_v32  ;;  %v1151_v35 = vld [vmem:[#allocation10 + $0x34] sm:$0xf0]  ;;  %v1150_v36 = vld [vmem:[#allocation10 + $0x34] sm:$0xf]  ;;  %v908_v38 = vld [vmem:[#allocation10 + $0x38] sm:$0xf0] }
  0x30   :  { %v907_v37 = vor.u32 %v1151_v35, %v906_v34  ;;  %v911_v39 = vor.u32 %v1150_v36, %v908_v38  ;;  %v898_v40 = vld [vmem:[#allocation10 + $0x20] sm:$0xf]  ;;  %v1149_v41 = vld [vmem:[#allocation10 + $0x24] sm:$0xf0]  ;;  %v1148_v42 = vld [vmem:[#allocation10 + $0x24] sm:$0xf] }
  0x31   :  { %v899_v43 = vor.u32 %v1149_v41, %v898_v40  ;;  %v900_v44 = vld [vmem:[#allocation10 + $0x28] sm:$0xf0]  ;;  %v890_v45 = vld [vmem:[#allocation10 + $0x10] sm:$0xf]  ;;  %v1147_v46 = vld [vmem:[#allocation10 + $0x14] sm:$0xf0] }
  0x32   :  { %352 = vmatpush.bf16.msra.mxu1 %v923_v20  ;;  %v903_v47 = vor.u32 %v1148_v42, %v900_v44  ;;  %v1146_v48 = vld [vmem:[#allocation10 + $0x14] sm:$0xf]  ;;  %v892_v49 = vld [vmem:[#allocation10 + $0x18] sm:$0xf0]  ;;  %v891_v50 = vor.u32 %v1147_v46, %v890_v45  ;;  %v882_v52 = vld [vmem:[#allocation10] sm:$0xf] }
  0x33   :  { %233 = vmatpush.bf16.msra.mxu0 %v1140_v19  ;;  %365 = vmatpush.bf16.msra.mxu2 %v927_v21  ;;  %v895_v51 = vor.u32 %v1146_v48, %v892_v49  ;;  %v1145_v53 = vld [vmem:[#allocation10 + $0x4] sm:$0xf0]  ;;  %v1144_v54 = vld [vmem:[#allocation10 + $0x4] sm:$0xf]  ;;  %v884_v55 = vld [vmem:[#allocation10 + $0x8] sm:$0xf0] }
  0x34   :  { %v883_v56 = vor.u32 %v1145_v53, %v882_v52  ;;  %v887_v57 = vor.u32 %v1144_v54, %v884_v55  ;;  %v1002_v58 = vld [vmem:[#allocation15 + $0x70] sm:$0xf]  ;;  %v1175_v59 = vld [vmem:[#allocation15 + $0x74] sm:$0xf0]  ;;  %v1174_v60 = vld [vmem:[#allocation15 + $0x74] sm:$0xf] }
  0x35   :  { %v1003_v61 = vor.u32 %v1175_v59, %v1002_v58  ;;  %v1004_v62 = vld [vmem:[#allocation15 + $0x78] sm:$0xf0]  ;;  %v994_v63 = vld [vmem:[#allocation15 + $0x60] sm:$0xf]  ;;  %v1173_v0 = vld [vmem:[#allocation15 + $0x64] sm:$0xf0] }
  0x36   :  { %353 = vmatpush.bf16.msra.mxu1 %v915_v31  ;;  %v1007_v1 = vor.u32 %v1174_v60, %v1004_v62  ;;  %v1172_v2 = vld [vmem:[#allocation15 + $0x64] sm:$0xf]  ;;  %v996_v3 = vld [vmem:[#allocation15 + $0x68] sm:$0xf0]  ;;  %v1066_v4 = vld [vmem:[#allocation15 + $0xf0] sm:$0xf]  ;;  %v995_v5 = vor.u32 %v1173_v0, %v994_v63 }
  0x37   :  { %234 = vmatpush.bf16.msra.mxu0 %v1139_v22  ;;  %366 = vmatpush.bf16.msra.mxu2 %v919_v33  ;;  %v1191_v6 = vld [vmem:[#allocation15 + $0xf4] sm:$0xf0]  ;;  %v1190_v7 = vld [vmem:[#allocation15 + $0xf4] sm:$0xf]  ;;  %v1068_v8 = vld [vmem:[#allocation15 + $0xf8] sm:$0xf0]  ;;  %v999_v9 = vor.u32 %v1172_v2, %v996_v3 }
  0x38   :  { %583 = vmatpush.bf16.msra.mxu3 %v1003_v61  ;;  %v1067_v10 = vor.u32 %v1191_v6, %v1066_v4  ;;  %v1071_v11 = vor.u32 %v1190_v7, %v1068_v8  ;;  %v986_v12 = vld [vmem:[#allocation15 + $0x50] sm:$0xf]  ;;  %v1171_v13 = vld [vmem:[#allocation15 + $0x54] sm:$0xf0]  ;;  %v1170_v14 = vld [vmem:[#allocation15 + $0x54] sm:$0xf] }
  0x39   :  { %v988_v15 = vld [vmem:[#allocation15 + $0x58] sm:$0xf0]  ;;  %v1058_v16 = vld [vmem:[#allocation15 + $0xe0] sm:$0xf]  ;;  %v1189_v17 = vld [vmem:[#allocation15 + $0xe4] sm:$0xf0]  ;;  %v987_v22 = vor.u32 %v1171_v13, %v986_v12 }
  0x3a   :  { %354 = vmatpush.bf16.msra.mxu1 %v907_v37  ;;  %v1059_v18 = vor.u32 %v1189_v17, %v1058_v16  ;;  %v1188_v19 = vld [vmem:[#allocation15 + $0xe4] sm:$0xf]  ;;  %v1060_v20 = vld [vmem:[#allocation15 + $0xe8] sm:$0xf0]  ;;  %v1222_v21 = vld [vmem:[#allocation9] ss:$0 sm:$0xff]  ;;  %v991_v26 = vor.u32 %v1170_v14, %v988_v15  ;;  %v1605_v37 = vstv %s159_s10 }
  0x3b   :  { %235 = vmatpush.bf16.msra.mxu0 %v1138_v23  ;;  %367 = vmatpush.bf16.msra.mxu2 %v911_v39  ;;  %v1063_v23 = vor.u32 %v1188_v19, %v1060_v20  ;;  %v1187_v28 = vld [vmem:[#allocation15 + $0xd4] sm:$0xf0]  ;;  %v1186_v29 = vld [vmem:[#allocation15 + $0xd4] sm:$0xf]  ;;  %v1168_v30 = vld [vmem:[#allocation15 + $0x44] sm:$0xf] }
  0x3c   :  { %584 = vmatpush.bf16.msra.mxu3 %v995_v5  ;;  %v980_v31 = vld [vmem:[#allocation15 + $0x48] sm:$0xf0]  ;;  %v1052_v32 = vld [vmem:[#allocation15 + $0xd8] sm:$0xf0]  ;;  %v1042_v35 = vld [vmem:[#allocation15 + $0xc0] sm:$0xf] }
  0x3d   :  { %v1055_v34 = vor.u32 %v1186_v29, %v1052_v32  ;;  %v1185_v39 = vld [vmem:[#allocation15 + $0xc4] sm:$0xf0]  ;;  %v1184_v40 = vld [vmem:[#allocation15 + $0xc4] sm:$0xf]  ;;  %v1044_v41 = vld [vmem:[#allocation15 + $0xc8] sm:$0xf0] }
  0x3e   :  { %355 = vmatpush.bf16.msra.mxu1 %v899_v43  ;;  %v983_v43 = vor.u32 %v1168_v30, %v980_v31  ;;  %v970_v44 = vld [vmem:[#allocation15 + $0x30] sm:$0xf]  ;;  %v1167_v45 = vld [vmem:[#allocation15 + $0x34] sm:$0xf0]  ;;  %v1166_v46 = vld [vmem:[#allocation15 + $0x34] sm:$0xf]  ;;  %v1043_v49 = vor.u32 %v1185_v39, %v1042_v35 }
  0x3f   :  { %236 = vmatpush.bf16.msra.mxu0 %v1137_v24  ;;  %368 = vmatpush.bf16.msra.mxu2 %v903_v47  ;;  %v978_v24 = vld [vmem:[#allocation15 + $0x40] sm:$0xf]  ;;  %v972_v47 = vld [vmem:[#allocation15 + $0x38] sm:$0xf0]  ;;  %v1165_v54 = vld [vmem:[#allocation15 + $0x24] sm:$0xf0] }
  0x40   :  { %585 = vmatpush.bf16.msra.mxu3 %v987_v22  ;;  %v975_v52 = vor.u32 %v1166_v46, %v972_v47  ;;  %v962_v53 = vld [vmem:[#allocation15 + $0x20] sm:$0xf]  ;;  %v1164_v55 = vld [vmem:[#allocation15 + $0x24] sm:$0xf]  ;;  %v1034_v63 = vld [vmem:[#allocation15 + $0xb0] sm:$0xf] }
  0x41   :  { %v963_v58 = vor.u32 %v1165_v54, %v962_v53  ;;  %v1183_v0 = vld [vmem:[#allocation15 + $0xb4] sm:$0xf0]  ;;  %v1036_v3 = vld [vmem:[#allocation15 + $0xb8] sm:$0xf0]  ;;  %v954_v5 = vld [vmem:[#allocation15 + $0x10] sm:$0xf] }
  0x42   :  { %356 = vmatpush.bf16.msra.mxu1 %v891_v50  ;;  %v1047_v50 = vor.u32 %v1184_v40, %v1044_v41  ;;  %v1035_v2 = vor.u32 %v1183_v0, %v1034_v63  ;;  %v1163_v6 = vld [vmem:[#allocation15 + $0x14] sm:$0xf0]  ;;  %v1162_v7 = vld [vmem:[#allocation15 + $0x14] sm:$0xf]  ;;  %v1180_v14 = vld [vmem:[#allocation15 + $0xa4] sm:$0xf] }
  0x43   :  { %237 = vmatpush.bf16.msra.mxu0 %v1136_v25  ;;  %369 = vmatpush.bf16.msra.mxu2 %v895_v51  ;;  %v1169_v25 = vld [vmem:[#allocation15 + $0x44] sm:$0xf0]  ;;  %v971_v51 = vor.u32 %v1167_v45, %v970_v44  ;;  %v955_v8 = vor.u32 %v1163_v6, %v954_v5  ;;  %v1028_v15 = vld [vmem:[#allocation15 + $0xa8] sm:$0xf0]  ;;  %v946_v17 = vld [vmem:[#allocation15] sm:$0xf] }
  0x44   :  { %v979_v38 = vor.u32 %v1169_v25, %v978_v24  ;;  %v1031_v16 = vor.u32 %v1180_v14, %v1028_v15  ;;  %v1160_v19 = vld [vmem:[#allocation15 + $0x4] sm:$0xf]  ;;  %v1018_v22 = vld [vmem:[#allocation15 + $0x90] sm:$0xf]  ;;  %v1010_v29 = vld [vmem:[#allocation15 + $0x80] sm:$0xf] }
  0x45   :  { %v1177_v30 = vld [vmem:[#allocation15 + $0x84] sm:$0xf0]  ;;  %v1176_v31 = vld [vmem:[#allocation15 + $0x84] sm:$0xf]  ;;  %v1199_v35 = vld [vmem:[#allocation12 + $0x38] sm:$0xff]  ;;  %s157_s23 = sadd.f32 0.5, %s156_s19 }
  0x46   :  { %238 = vmatmul.bf16.vlgmr.msra.gmra.mxu0 %v161_v27  ;;  %357 = vmatpush.bf16.msra.mxu1 %v883_v56  ;;  %v1050_v27 = vld [vmem:[#allocation15 + $0xd0] sm:$0xf]  ;;  %v964_v56 = vld [vmem:[#allocation15 + $0x28] sm:$0xf0]  ;;  %v1011_v32 = vor.u32 %v1177_v30, %v1010_v29  ;;  %v1196_v39 = vld [vmem:[#allocation12 + $0x20] sm:$0xff] }
  0x47   :  { %370 = vmatpush.bf16.msra.mxu2 %v887_v57  ;;  %596 = vmatpush.bf16.msrb.mxu0 %v1067_v10  ;;  %v1051_v33 = vor.u32 %v1187_v28, %v1050_v27  ;;  %v967_v59 = vor.u32 %v1164_v55, %v964_v56  ;;  %v1026_v10 = vld [vmem:[#allocation15 + $0xa0] sm:$0xf]  ;;  %v1020_v27 = vld [vmem:[#allocation15 + $0x98] sm:$0xf0]  ;;  %v264_v40 = vld [vmem:[%s1636_s5] sm:$0x3] }
  0x48   :  { %586 = vmatpush.bf16.msra.mxu3 %v979_v38  ;;  %v1197_v38 = vld [vmem:[#allocation12 + $0x28] sm:$0xff]  ;;  %v266_v41 = vperm.slane %v264_v40, 0  ;;  %v267_v46 = vperm.slane %v264_v40, 1  ;;  %v417_v63 = vld [vmem:[%s1642_s11] sm:$0x3] }
  0x49   :  { %v419_v0 = vperm.slane %v417_v63, 0  ;;  %v1205_v15 = vld [vmem:[#allocation13 + $0x28] sm:$0xff] }
  0x4a   :  { %609 = vmatpush.bf16.msrb.mxu1 %v1007_v1  ;;  %v1182_v1 = vld [vmem:[#allocation15 + $0xb4] sm:$0xf] }
  0x4b   :  { %622 = vmatpush.bf16.msrb.mxu2 %v1071_v11  ;;  %597 = vmatpush.bf16.msrb.mxu0 %v1059_v18  ;;  %v1039_v4 = vor.u32 %v1182_v1, %v1036_v3  ;;  %v1181_v11 = vld [vmem:[#allocation15 + $0xa4] sm:$0xf0] }
  0x4c   :  { %587 = vmatpush.bf16.msra.mxu3 %v971_v51  ;;  %v1027_v13 = vor.u32 %v1181_v11, %v1026_v10  ;;  %v1161_v18 = vld [vmem:[#allocation15 + $0x4] sm:$0xf0] }
  0x4d   :  { %v947_v20 = vor.u32 %v1161_v18, %v946_v17  ;;  %v1203_v17 = vld [vmem:[#allocation13 + $0x18] sm:$0xff]  ;;  %v1202_v18 = vld [vmem:[#allocation13 + $0x10] sm:$0xff] }
  0x4e   :  { %610 = vmatpush.bf16.msrb.mxu1 %v999_v9  ;;  %v956_v9 = vld [vmem:[#allocation15 + $0x18] sm:$0xf0] }
  0x4f   :  { %623 = vmatpush.bf16.msrb.mxu2 %v1063_v23  ;;  %598 = vmatpush.bf16.msrb.mxu0 %v1051_v33  ;;  %v959_v12 = vor.u32 %v1162_v7, %v956_v9  ;;  %v1179_v23 = vld [vmem:[#allocation15 + $0x94] sm:$0xf0]  ;;  %v1012_v33 = vld [vmem:[#allocation15 + $0x88] sm:$0xf0] }
  0x50   :  { %588 = vmatpush.bf16.msra.mxu3 %v963_v58  ;;  %v1019_v25 = vor.u32 %v1179_v23, %v1018_v22  ;;  %v1194_v58 = vld [vmem:[#allocation12 + $0x10] sm:$0xff] }
  0x52   :  { %611 = vmatpush.bf16.msrb.mxu1 %v991_v26  ;;  %v1178_v26 = vld [vmem:[#allocation15 + $0x94] sm:$0xf] }
  0x53   :  { %624 = vmatpush.bf16.msrb.mxu2 %v1055_v34  ;;  %599 = vmatpush.bf16.msrb.mxu0 %v1043_v49  ;;  %v1023_v28 = vor.u32 %v1178_v26, %v1020_v27  ;;  %v1015_v34 = vor.u32 %v1176_v31, %v1012_v33  ;;  %v1224_v31 = vld [vmem:[%s1640_s9] ss:$0 sm:$0xff] }
  0x54   :  { %589 = vmatpush.bf16.msra.mxu3 %v955_v8 }
  0x56   :  { %612 = vmatpush.bf16.msrb.mxu1 %v983_v43  ;;  %v1611_v43 = vstv %s157_s23 }
  0x57   :  { %625 = vmatpush.bf16.msrb.mxu2 %v1047_v50  ;;  %600 = vmatpush.bf16.msrb.mxu0 %v1035_v2  ;;  %v420_v2 = vperm.slane %v417_v63, 1 }
  0x58   :  { %590 = vmatpush.bf16.msra.mxu3 %v947_v20  ;;  %v1200_v20 = vld [vmem:[#allocation13] sm:$0xff] }
  0x5a   :  { %613 = vmatpush.bf16.msrb.mxu1 %v975_v52 }
  0x5b   :  { %626 = vmatpush.bf16.msrb.mxu2 %v1039_v4  ;;  %601 = vmatpush.bf16.msrb.mxu0 %v1027_v13 }
  0x5c   :  { %705 = vmatpush.bf16.msrb.mxu3 %v1199_v35 }
  0x5e   :  { %614 = vmatpush.bf16.msrb.mxu1 %v967_v59  ;;  %v1193_v59 = vld [vmem:[#allocation12 + $0x8] sm:$0xff] }
  0x5f   :  { %627 = vmatpush.bf16.msrb.mxu2 %v1031_v16  ;;  %602 = vmatpush.bf16.msrb.mxu0 %v1019_v25  ;;  %v1204_v16 = vld [vmem:[#allocation13 + $0x20] sm:$0xff] }
  0x62   :  { %615 = vmatpush.bf16.msrb.mxu1 %v959_v12 }
  0x63   :  { %628 = vmatpush.bf16.msrb.mxu2 %v1023_v28  ;;  %603 = vmatpush.bf16.msrb.mxu0 %v1011_v32 }
  0x67   :  { %629 = vmatpush.bf16.msrb.mxu2 %v1015_v34 }
  0xc3   :  { %v239_v36 = vpop.f32.mrf.mxu0 }
  0xc4   :  { %v240_v42 = vadd.f32 %v1222_v21, %v239_v36  ;;  %v948_v21 = vld [vmem:[#allocation15 + $0x8] sm:$0xf0]  ;;  %v1198_v36 = vld [vmem:[#allocation12 + $0x30] sm:$0xff] }
  0xc5   :  { %v951_v24 = vor.u32 %v1160_v19, %v948_v21  ;;  %706 = vmatpush.bf16.msrb.mxu3 %v1198_v36  ;;  %v1201_v19 = vld [vmem:[#allocation13 + $0x8] sm:$0xff]  ;;  %v1223_v21 = vld [vmem:[%s1638_s7] ss:$0 sm:$0xff]  ;;  %s818_s7 = sshll.u32 %s1643_s12, 4  ;;  %s819_s7 = int_to_ptr.hbm [resolvable:$true] %s818_s7 }
  0xc6   :  { %v244_v48 = vmul.f32 %v1605_v37, %v240_v42 }
  0xc7   :  { %616 = vmatpush.bf16.msrb.mxu1 %v951_v24 }
  0xc8   :  { %1225 = vtanh.f32 %v244_v48 }
  0xc9   :  { %707 = vmatpush.bf16.msrb.mxu3 %v1197_v38 }
  0xcb   :  { %v241_v57 = vpop.f32.mrf.mxu0 }
  0xcc   :  { %v1195_v57 = vld [vmem:[#allocation12 + $0x18] sm:$0xff] }
  0xcd   :  { %708 = vmatpush.bf16.msrb.mxu3 %v1196_v39 }
  0xce   :  { %v1226_v60 = vpop.eup %1225 }
  0xcf   :  { %1227 = vtanh.f32 %v1226_v60  ;;  %v1192_v60 = vld [vmem:[#allocation12] sm:$0xff] }
  0xd1   :  { %709 = vmatpush.bf16.msrb.mxu3 %v1195_v57 }
  0xd5   :  { %v1228_v61 = vpop.eup %1227  ;;  %710 = vmatpush.bf16.msrb.mxu3 %v1194_v58 }
  0xd6   :  { %v247_v62 = vpack.c.bf16 %v1228_v61, %v1228_v61  ;;  %v1207_v61 = vld [vmem:[#allocation13 + $0x38] sm:$0xff] }
  0xd7   :  { %791 = vmatpush.bf16.msra.mxu0 %v1207_v61 }
  0xd8   :  { %358 = vmatmul.bf16.vlgmr.msra.gmra.mxu1 %v247_v62  ;;  %371 = vmatmul.bf16.vlgmr.msra.gmra.mxu2 %v247_v62  ;;  %v1206_v62 = vld [vmem:[#allocation13 + $0x30] sm:$0xff] }
  0xd9   :  { %711 = vmatpush.bf16.msrb.mxu3 %v1193_v59 }
  0xdb   :  { %792 = vmatpush.bf16.msra.mxu0 %v1206_v62 }
  0xdd   :  { %712 = vmatpush.bf16.msrb.mxu3 %v1192_v60 }
  0xdf   :  { %793 = vmatpush.bf16.msra.mxu0 %v1205_v15 }
  0xe3   :  { %794 = vmatpush.bf16.msra.mxu0 %v1204_v16 }
  0xe7   :  { %795 = vmatpush.bf16.msra.mxu0 %v1203_v17 }
  0xeb   :  { %796 = vmatpush.bf16.msra.mxu0 %v1202_v18 }
  0xef   :  { %797 = vmatpush.bf16.msra.mxu0 %v1201_v19 }
  0xf3   :  { %798 = vmatpush.bf16.msra.mxu0 %v1200_v20 }
 0x155   :  { %v359_v42 = vpop.f32.mrf.mxu1 }
 0x156   :  { %v360_v44 = vadd.f32 %v359_v42, %v266_v41 }
 0x158   :  { %v377_v45 = vmul.f32 %v1611_v43, %v360_v44 }
 0x15a   :  { %vm378_vm0 = vcmp.ge.f32.partialorder %v377_v45, 0.0  ;;  %v379_v47 = vmul.f32 0.1, %v377_v45 }
 0x15b   :  { %v372_v48 = vpop.f32.mrf.mxu2 }
 0x15c   :  { %v373_v49 = vadd.f32 %v372_v48, %v267_v46  ;;  %v380_v50 = vsel %vm378_vm0, %v377_v45, %v379_v47 }
 0x15d   :  { %v361_v51 = vpop.f32.mrf.mxu1  ;;  %v383_v52 = vpack.c.bf16 %v380_v50, %v380_v50 }
 0x15e   :  { %v381_v53 = vmul.f32 %v373_v49, %v1605_v37 }
 0x15f   :  { %591 = vmatmul.bf16.vlgmr.msra.gmra.mxu3 %v383_v52  ;;  %617 = vmatmul.bf16.vlgmr.msrb.gmra.mxu1 %v383_v52 }
 0x160   :  { %v382_v54 = vmax.f32 %v381_v53, 0.0 }
 0x162   :  { %v384_v55 = vpack.c.bf16 %v382_v54, %v382_v54 }
 0x163   :  { %v374_v56 = vpop.f32.mrf.mxu2 }
 0x164   :  { %604 = vmatmul.bf16.vlgmr.msrb.gmra.mxu0 %v384_v55  ;;  %630 = vmatmul.bf16.vlgmr.msrb.gmra.mxu2 %v384_v55 }
 0x1dc   :  { %v618_v37 = vpop.f32.mrf.mxu1 }
 0x1dd   :  { %v619_v7 = vadd.f32 %v618_v37, %v420_v2 }
 0x1e1   :  { %v605_v1 = vpop.f32.mrf.mxu0 }
 0x1e2   :  { %v592_v3 = vpop.f32.mrf.mxu3 }
 0x1e3   :  { %v593_v4 = vadd.f32 %v592_v3, %v419_v0 }
 0x1e4   :  { %v620_v5 = vpop.f32.mrf.mxu1 }
 0x1e5   :  { %v606_v6 = vadd.f32 %v605_v1, %v593_v4 }
 0x1e7   :  { %v631_v8 = vpop.f32.mrf.mxu2  ;;  %v635_v9 = vadd.f32 %v606_v6, %v382_v54 }
 0x1e8   :  { %v632_v10 = vadd.f32 %v631_v8, %v619_v7 }
 0x1e9   :  { %v607_v11 = vpop.f32.mrf.mxu0  ;;  %v636_v12 = vpack.c.bf16 %v635_v9, %v635_v9 }
 0x1ea   :  { %v594_v13 = vpop.f32.mrf.mxu3 }
 0x1eb   :  { %713 = vmatmul.bf16.vlgmr.msrb.gmra.mxu3 %v636_v12 }
 0x1ef   :  { %v633_v14 = vpop.f32.mrf.mxu2 }
 0x26e   :  { %v714_v22 = vpop.f32.mrf.mxu3 }
 0x26f   :  { %v715_v23 = vadd.f32 %v1223_v21, %v714_v22 }
 0x271   :  { %v718_v24 = vmul.f32 %v715_v23, %v1611_v43 }
 0x273   :  { %1229 = vtanh.f32 %v718_v24 }
 0x276   :  { %v716_v25 = vpop.f32.mrf.mxu3 }
 0x279   :  { %v1230_v26 = vpop.eup %1229 }
 0x27a   :  { %1231 = vtanh.f32 %v1230_v26 }
 0x280   :  { %v1232_v27 = vpop.eup %1231 }
 0x281   :  { %v721_v28 = vadd.f32 %v1232_v27, %v632_v10  ;;  %1233 = vtanh.f32 %v1232_v27 }
 0x283   :  { %v722_v29 = vpack.c.bf16 %v721_v28, %v721_v28 }
 0x285   :  { %799 = vmatmul.bf16.vlgmr.msra.gmra.mxu0 %v722_v29 }
 0x287   :  { %v1234_v30 = vpop.eup %1233 }
 0x288   :  { %809 = vst [vmem:[#allocation16] sm:$0xff] %v1234_v30 }
 0x289   :  { %821 = dma.vmem_to_hbm [thread:$0]  %s817_s15, 128, %s819_s7, [#allocation6]  }
 0x302   :  { %v800_v32 = vpop.f32.mrf.mxu0 }
 0x303   :  { %v801_v33 = vadd.f32 %v1224_v31, %v800_v32 }
 0x305   :  { %v804_v34 = vmul.f32 0.5, %v801_v33 }
 0x307   :  { %1235 = vtanh.f32 %v804_v34 }
 0x30a   :  { %v802_v35 = vpop.f32.mrf.mxu0 }
 0x30d   :  { %v1236_v36 = vpop.eup %1235 }
 0x30e   :  { %v806_v38 = vadd.f32 1.0, %v1236_v36 }
 0x310   :  { %v807_v39 = vmul.f32 0.5, %v806_v38 }
 0x312   :  { %810 = vst [vmem:[#allocation17] sm:$0xff] %v807_v39 }
 0x313   :  { %832 = dma.vmem_to_hbm [thread:$0]  %s828_s21, 128, %s830_s24, [#allocation18]  }
 0x314   :  { %1475 = dma.done.wait [#allocation6], 128  }
 0x315   :  { %1476 = vsyncadd [#allocation6], 4294967168 }
 0x316   :  { %1477 = dma.done.wait [#allocation18], 128  }
 0x317   :  { %1478 = vsyncadd [#allocation18], 4294967168 }
 0x318   :  { %841 = vsyncpa [#allocation5], 1 }
 0x319   :  { %842 = vsyncpa [#allocation8], 1 }
 0x31a   :  { %843 = vsyncpa [#allocation11], 1 }
 0x31b   :  { %844 = vsyncpa [#allocation14], 1 }
 0x31c   :  { %845 = vsyncpa [#allocation6], 1 }
 0x31d   :  { %846 = vsyncpa [#allocation18], 1 }

</bundles_post_ra>
